<compile_context>
chip_gen: v6e
topology: v6e:2x2x1
jax: 0.10.0
libtpu: 0.0.40
codegen_flags: <defaults>
</compile_context>

<pallas_src>
import functools

import jax
import jax.numpy as jnp
import numpy as np
from jax.experimental import pallas as pl
from jax.experimental.pallas import tpu as pltpu


def _round_up(x, m):
    return ((x + m - 1) // m) * m


def _lstm_chunk_kernel(x_ref, wih_ref, whh_ref, out_ref,
                       gx_sc, out_sc, h_sc, c_sc, *, Hp, TC, BB, unroll):
    """One grid step = one (batch block, time chunk).

    x_ref   : (TC, BB, Fa)   raw inputs (augmented with a ones column for the bias)
    wih_ref : (Fa, 4*Hp)     bias-augmented W_ih^T, zero-padded, gate-blocked
    whh_ref : (Hp, 4*Hp)     W_hh^T, zero-padded, gate-blocked
    out_ref : (BB, TC, Hp)   batch-major hidden states for this chunk
    gx_sc   : (TC, BB, 4*Hp) chunk gates_x scratch (computed here, off the serial path)
    out_sc  : (TC, BB, Hp)   time-major chunk outputs (dense per-step stores)
    h_sc/c_sc : (BB, Hp)     recurrence carry, persists across time chunks
    """
    # Reset the carry at the start of each batch block's time sweep.
    @pl.when(pl.program_id(1) == 0)
    def _():
        h_sc[...] = jnp.zeros_like(h_sc)
        c_sc[...] = jnp.zeros_like(c_sc)

    # Chunk input projection (one batched matmul, NOT per timestep):
    #   gates_x = [x | 1] @ [W_ih^T ; (b_ih+b_hh)]
    fa = x_ref.shape[-1]
    x2d = x_ref[...].reshape(TC * BB, fa)
    gx_sc[...] = jnp.dot(
        x2d, wih_ref[...], preferred_element_type=jnp.float32
    ).reshape(TC, BB, 4 * Hp)

    whh = whh_ref[...]  # grid-invariant recurrent weights

    def step(t, carry):
        h, c = carry
        # Only the h @ W_hh^T matmul sits on the serial dependency chain.
        gates = gx_sc[t] + jnp.dot(h, whh, preferred_element_type=jnp.float32)
        # PyTorch gate order: i, f, g, o  (static, lane-aligned slices of width Hp)
        i_g = jax.nn.sigmoid(gates[:, 0 * Hp:1 * Hp])
        f_g = jax.nn.sigmoid(gates[:, 1 * Hp:2 * Hp])
        g_g = jnp.tanh(gates[:, 2 * Hp:3 * Hp])
        o_g = jax.nn.sigmoid(gates[:, 3 * Hp:4 * Hp])
        c = f_g * c + i_g * g_g
        h = o_g * jnp.tanh(c)
        # (1, BB, Hp) slab = BB sublanes x Hp lanes -> unmasked lane-dense store.
        out_sc[pl.ds(t, 1)] = h[None]
        return h, c

    h, c = jax.lax.fori_loop(0, TC, step, (h_sc[...], c_sc[...]), unroll=unroll)
    h_sc[...] = h
    c_sc[...] = c

    # Batch-major writeback: strided sublane reads from the time-major VMEM scratch,
    # dense (TC, Hp) stores into the (BB, TC, Hp) output block.  This replaces the
    # wrapper-side transpose (a full extra HBM read+write pass over lstm_out).
    for b in range(BB):  # BB is a small static int
        out_ref[b] = out_sc[:, b, :]


@functools.partial(jax.jit, static_argnames=("hidden_size",))
def lstm_encoder_forward(x, w_ih, w_hh, b_ih, b_hh, *, hidden_size):
    """Pallas implementation of LSTMEncoder.forward (unidirectional, 1 layer).

    x    : [B, T, F]  (batch_first, like PyTorch; [B, T] also accepted)
    w_ih : [4H, F], w_hh : [4H, H], b_ih/b_hh : [4H]
    returns (lstm_out [B, T, H], ht [B, H])
    """
    if x.ndim == 2:  # mirrors input_seq.unsqueeze_(2) in the module
        x = x[:, :, None]
    B, T, F = x.shape
    H = hidden_size

    if T == 0:
        return jnp.zeros((B, 0, H), jnp.float32), jnp.zeros((B, H), jnp.float32)

    Hp = _round_up(H, 128)       # lane-dense hidden width
    G4 = 4 * Hp

    # Batch blocking: two blocks (for v7x's two TensorCores) once batch is big enough.
    if B >= 16:
        n_bblk = 2
        Bp = _round_up(B, 16)
    else:
        n_bblk = 1
        Bp = _round_up(B, 8)
    BB = Bp // n_bblk            # multiple of 8 sublanes

    # Balanced time chunks near 128 steps: amortizes grid-step overhead, keeps the
    # padded tail (< 8 wasted serial steps per chunk) negligible, and keeps TC a
    # multiple of 8 so the batch-major out block (BB, TC, Hp) is sublane-aligned.
    n_chunks = pl.cdiv(T, 128)
    TC = _round_up(pl.cdiv(T, n_chunks), 8)
    Tp = n_chunks * TC

    Fa = _round_up(F + 1, 8)     # +1 ones column carries the (b_ih + b_hh) bias

    xf = x.astype(jnp.float32)

    # Time-major augmented input: [Tp, Bp, Fa], ones column at index F (tiny vs gx).
    x_aug = jnp.concatenate([xf, jnp.ones((B, T, 1), jnp.float32)], axis=-1)
    x_tm = jnp.transpose(x_aug, (1, 0, 2))
    x_tm = jnp.pad(x_tm, ((0, Tp - T), (0, Bp - B), (0, Fa - (F + 1))))

    # Bias-augmented W_ih^T, gate-blocked and zero-padded to [Fa, 4*Hp].
    wih_t = w_ih.astype(jnp.float32).T.reshape(F, 4, H)
    bias = (b_ih + b_hh).astype(jnp.float32).reshape(1, 4, H)
    wih_aug = jnp.concatenate([wih_t, bias], axis=0)                 # (F+1, 4, H)
    wih_aug = jnp.pad(wih_aug, ((0, Fa - (F + 1)), (0, 0), (0, Hp - H)))
    wih_aug = wih_aug.reshape(Fa, G4)

    # W_hh^T, gate-blocked and zero-padded to [Hp, 4*Hp].
    whh_t = w_hh.astype(jnp.float32).T.reshape(H, 4, H)
    whh_t = jnp.pad(whh_t, ((0, Hp - H), (0, 0), (0, Hp - H)))
    whh_t = whh_t.reshape(Hp, G4)

    unroll = min(TC, 8)
    kernel = functools.partial(_lstm_chunk_kernel, Hp=Hp, TC=TC, BB=BB, unroll=unroll)

    out_bm = pl.pallas_call(
        kernel,
        out_shape=jax.ShapeDtypeStruct((Bp, Tp, Hp), jnp.float32),
        grid_spec=pltpu.PrefetchScalarGridSpec(
            num_scalar_prefetch=0,
            grid=(n_bblk, n_chunks),
            in_specs=[
                pl.BlockSpec((TC, BB, Fa), lambda b, c: (c, b, 0)),   # raw x chunk
                pl.BlockSpec((Fa, G4), lambda b, c: (0, 0)),          # W_ih^T (+bias row)
                pl.BlockSpec((Hp, G4), lambda b, c: (0, 0)),          # W_hh^T
            ],
            out_specs=pl.BlockSpec((BB, TC, Hp), lambda b, c: (b, c, 0)),
            scratch_shapes=[
                pltpu.VMEM((TC, BB, G4), jnp.float32),   # gates_x for the chunk
                pltpu.VMEM((TC, BB, Hp), jnp.float32),   # time-major chunk outputs
                pltpu.VMEM((BB, Hp), jnp.float32),       # h carry
                pltpu.VMEM((BB, Hp), jnp.float32),       # c carry
            ],
        ),
        compiler_params=pltpu.CompilerParams(
            # batch blocks independent (v7x megacore); time chunks sequential (recurrence)
            dimension_semantics=("parallel", "arbitrary"),
        ),
    )(x_tm, wih_aug, whh_t)

    # Batch-major output: final hidden state is just the last timestep (no extra
    # kernel output, no wrapper transpose).
    lstm_out = out_bm[:B, :T, :H]
    ht = lstm_out[:, -1, :]
    return lstm_out, ht


def _reference_lstm(x, w_ih, w_hh, b_ih, b_hh, H):
    """Pure-JAX reference (lax.scan) matching torch.nn.LSTM semantics."""
    B, T, F = x.shape
    h0 = jnp.zeros((B, H), jnp.float32)
    c0 = jnp.zeros((B, H), jnp.float32)

    def step(carry, x_t):
        h, c = carry
        gates = x_t @ w_ih.T + b_ih + h @ w_hh.T + b_hh
        i = jax.nn.sigmoid(gates[:, 0 * H:1 * H])
        f = jax.nn.sigmoid(gates[:, 1 * H:2 * H])
        g = jnp.tanh(gates[:, 2 * H:3 * H])
        o = jax.nn.sigmoid(gates[:, 3 * H:4 * H])
        c = f * c + i * g
        h = o * jnp.tanh(c)
        return (h, c), h

    (hT, _), hs = jax.lax.scan(step, (h0, c0), jnp.transpose(x, (1, 0, 2)))
    return jnp.transpose(hs, (1, 0, 2)), hT


if __name__ == "__main__":
    # Small shapes consistent with LSTMEncoder(input_feature_len=1, hidden_size=H).
    B, T, F, H = 2, 8, 1, 32

    key = jax.random.PRNGKey(0)
    k1, k2, k3, k4, k5 = jax.random.split(key, 5)
    bound = 1.0 / np.sqrt(H)  # same init scheme as torch.nn.LSTM
    w_ih = jax.random.uniform(k1, (4 * H, F), jnp.float32, -bound, bound)
    w_hh = jax.random.uniform(k2, (4 * H, H), jnp.float32, -bound, bound)
    b_ih = jax.random.uniform(k3, (4 * H,), jnp.float32, -bound, bound)
    b_hh = jax.random.uniform(k4, (4 * H,), jnp.float32, -bound, bound)

    x = jax.random.normal(k5, (B, T, F), jnp.float32)

    lstm_out, ht = lstm_encoder_forward(x, w_ih, w_hh, b_ih, b_hh, hidden_size=H)
    jax.block_until_ready((lstm_out, ht))

    ref_out, ref_ht = _reference_lstm(x, w_ih, w_hh, b_ih, b_hh, H)
    assert lstm_out.shape == (B, T, H) and ht.shape == (B, H)
    np.testing.assert_allclose(np.asarray(lstm_out), np.asarray(ref_out),
                               rtol=2e-5, atol=2e-5)
    np.testing.assert_allclose(np.asarray(ht), np.asarray(ref_ht),
                               rtol=2e-5, atol=2e-5)

    print("KERNEL_OK")
</pallas_src>

<mosaic_0001>
module attributes {stable_mosaic.version = 11 : i64} {
  func.func @_lstm_chunk_kernel(%arg0: i32, %arg1: i32, %arg2: memref<8x8x8xf32, #tpu.memory_space<vmem>>, %arg3: memref<8x512xf32, #tpu.memory_space<vmem>>, %arg4: memref<128x512xf32, #tpu.memory_space<vmem>>, %arg5: memref<8x8x128xf32, #tpu.memory_space<vmem>>, %arg6: memref<8x8x512xf32, #tpu.memory_space<vmem>>, %arg7: memref<8x8x128xf32, #tpu.memory_space<vmem>>, %arg8: memref<8x128xf32, #tpu.memory_space<vmem>>, %arg9: memref<8x128xf32, #tpu.memory_space<vmem>>) attributes {dimension_semantics = [#tpu.dimension_semantics<parallel>, #tpu.dimension_semantics<arbitrary>], iteration_bounds = array<i64: 1, 1>, scalar_prefetch = 0 : i64, scratch_operands = 4 : i64, tpu.core_type = #tpu.core_type<tc>, window_params = [{transform_indices = @transform_0, window_bounds = array<i64: 8, 8, 8>}, {pipeline_mode = #tpu.pipeline_mode<synchronous>, transform_indices = @transform_1, window_bounds = array<i64: 8, 512>}, {pipeline_mode = #tpu.pipeline_mode<synchronous>, transform_indices = @transform_2, window_bounds = array<i64: 128, 512>}, {transform_indices = @transform_3, window_bounds = array<i64: 8, 8, 128>}]} {
    %c0_i32 = arith.constant 0 : i32
    %0 = arith.cmpi eq, %arg1, %c0_i32 : i32
    %1 = arith.extui %0 : i1 to i32
    %c0_i32_0 = arith.constant 0 : i32
    %2 = arith.cmpi ne, %1, %c0_i32_0 : i32
    scf.if %2 {
      %cst_124 = arith.constant 0.000000e+00 : f32
      %318 = vector.broadcast %cst_124 : f32 to vector<8x128xf32>
      %c0_125 = arith.constant 0 : index
      %c0_126 = arith.constant 0 : index
      %319 = vector.load %arg8[%c0_125, %c0_126] : memref<8x128xf32, #tpu.memory_space<vmem>>, vector<8x128xf32>
      tpu.vector_store %arg8[%c0_125, %c0_126], %318 {strides = array<i32>} : memref<8x128xf32, #tpu.memory_space<vmem>>, vector<8x128xf32>,
      %cst_127 = arith.constant 0.000000e+00 : f32
      %320 = vector.broadcast %cst_127 : f32 to vector<8x128xf32>
      %c0_128 = arith.constant 0 : index
      %c0_129 = arith.constant 0 : index
      %321 = vector.load %arg9[%c0_128, %c0_129] : memref<8x128xf32, #tpu.memory_space<vmem>>, vector<8x128xf32>
      tpu.vector_store %arg9[%c0_128, %c0_129], %320 {strides = array<i32>} : memref<8x128xf32, #tpu.memory_space<vmem>>, vector<8x128xf32>,
    } else {
    }
    %c0 = arith.constant 0 : index
    %c0_1 = arith.constant 0 : index
    %c0_2 = arith.constant 0 : index
    %3 = vector.load %arg2[%c0, %c0_1, %c0_2] : memref<8x8x8xf32, #tpu.memory_space<vmem>>, vector<8x8x8xf32>
    %4 = vector.shape_cast %3 : vector<8x8x8xf32> to vector<64x8xf32>
    %c0_3 = arith.constant 0 : index
    %c0_4 = arith.constant 0 : index
    %5 = vector.load %arg3[%c0_3, %c0_4] : memref<8x512xf32, #tpu.memory_space<vmem>>, vector<8x512xf32>
    %cst = arith.constant dense<0.000000e+00> : vector<64x512xf32>
    %6 = tpu.matmul %4, %5, %cst {dimension_numbers = #tpu.dot_dimension_numbers<[1], [0], [0], [1], [0, 0, 1, 1], [], []>} : vector<64x8xf32>, vector<8x512xf32>, vector<64x512xf32> -> vector<64x512xf32>
    %7 = vector.shape_cast %6 : vector<64x512xf32> to vector<8x8x512xf32>
    %c0_5 = arith.constant 0 : index
    %c0_6 = arith.constant 0 : index
    %c0_7 = arith.constant 0 : index
    %8 = vector.load %arg6[%c0_5, %c0_6, %c0_7] : memref<8x8x512xf32, #tpu.memory_space<vmem>>, vector<8x8x512xf32>
    tpu.vector_store %arg6[%c0_5, %c0_6, %c0_7], %7 {strides = array<i32>} : memref<8x8x512xf32, #tpu.memory_space<vmem>>, vector<8x8x512xf32>,
    %c0_8 = arith.constant 0 : index
    %c0_9 = arith.constant 0 : index
    %9 = vector.load %arg4[%c0_8, %c0_9] : memref<128x512xf32, #tpu.memory_space<vmem>>, vector<128x512xf32>
    %c0_10 = arith.constant 0 : index
    %c0_11 = arith.constant 0 : index
    %10 = vector.load %arg8[%c0_10, %c0_11] : memref<8x128xf32, #tpu.memory_space<vmem>>, vector<8x128xf32>
    %c0_12 = arith.constant 0 : index
    %c0_13 = arith.constant 0 : index
    %11 = vector.load %arg9[%c0_12, %c0_13] : memref<8x128xf32, #tpu.memory_space<vmem>>, vector<8x128xf32>
    %c0_i32_14 = arith.constant 0 : i32
    %12 = arith.index_cast %c0_i32_14 : i32 to index
    %c0_15 = arith.constant 0 : index
    %c0_16 = arith.constant 0 : index
    %13 = vector.load %arg6[%12, %c0_15, %c0_16] : memref<8x8x512xf32, #tpu.memory_space<vmem>>, vector<1x8x512xf32>
    %14 = vector.shape_cast %13 : vector<1x8x512xf32> to vector<8x512xf32>
    %cst_17 = arith.constant dense<0.000000e+00> : vector<8x512xf32>
    %15 = tpu.matmul %10, %9, %cst_17 {dimension_numbers = #tpu.dot_dimension_numbers<[1], [0], [0], [1], [0, 0, 1, 1], [], []>} : vector<8x128xf32>, vector<128x512xf32>, vector<8x512xf32> -> vector<8x512xf32>
    %16 = arith.addf %14, %15 : vector<8x512xf32>
    %17 = vector.extract_strided_slice %16 {offsets = [0, 0], sizes = [8, 128], strides = [1, 1]} : vector<8x512xf32> to vector<8x128xf32>
    %18 = arith.negf %17 : vector<8x128xf32>
    %19 = math.exp %18 : vector<8x128xf32>
    %cst_18 = arith.constant 1.000000e+00 : f32
    %20 = vector.broadcast %cst_18 : f32 to vector<8x128xf32>
    %21 = arith.addf %20, %19 : vector<8x128xf32>
    %22 = arith.divf %20, %21 : vector<8x128xf32>
    %23 = vector.extract_strided_slice %16 {offsets = [0, 128], sizes = [8, 128], strides = [1, 1]} : vector<8x512xf32> to vector<8x128xf32>
    %24 = arith.negf %23 : vector<8x128xf32>
    %25 = math.exp %24 : vector<8x128xf32>
    %cst_19 = arith.constant 1.000000e+00 : f32
    %26 = vector.broadcast %cst_19 : f32 to vector<8x128xf32>
    %27 = arith.addf %26, %25 : vector<8x128xf32>
    %28 = arith.divf %26, %27 : vector<8x128xf32>
    %29 = vector.extract_strided_slice %16 {offsets = [0, 256], sizes = [8, 128], strides = [1, 1]} : vector<8x512xf32> to vector<8x128xf32>
    %30 = math.tanh %29 : vector<8x128xf32>
    %31 = vector.extract_strided_slice %16 {offsets = [0, 384], sizes = [8, 128], strides = [1, 1]} : vector<8x512xf32> to vector<8x128xf32>
    %32 = arith.negf %31 : vector<8x128xf32>
    %33 = math.exp %32 : vector<8x128xf32>
    %cst_20 = arith.constant 1.000000e+00 : f32
    %34 = vector.broadcast %cst_20 : f32 to vector<8x128xf32>
    %35 = arith.addf %34, %33 : vector<8x128xf32>
    %36 = arith.divf %34, %35 : vector<8x128xf32>
    %37 = arith.mulf %28, %11 : vector<8x128xf32>
    %38 = arith.mulf %22, %30 : vector<8x128xf32>
    %39 = arith.addf %37, %38 : vector<8x128xf32>
    %40 = math.tanh %39 : vector<8x128xf32>
    %41 = arith.mulf %36, %40 : vector<8x128xf32>
    %42 = vector.shape_cast %41 : vector<8x128xf32> to vector<1x8x128xf32>
    %43 = arith.index_cast %c0_i32_14 : i32 to index
    %c0_21 = arith.constant 0 : index
    %c0_22 = arith.constant 0 : index
    %44 = vector.load %arg7[%43, %c0_21, %c0_22] : memref<8x8x128xf32, #tpu.memory_space<vmem>>, vector<1x8x128xf32>
    tpu.vector_store %arg7[%43, %c0_21, %c0_22], %42 {strides = array<i32>} : memref<8x8x128xf32, #tpu.memory_space<vmem>>, vector<1x8x128xf32>,
    %c1_i32 = arith.constant 1 : i32
    %45 = arith.index_cast %c1_i32 : i32 to index
    %c0_23 = arith.constant 0 : index
    %c0_24 = arith.constant 0 : index
    %46 = vector.load %arg6[%45, %c0_23, %c0_24] : memref<8x8x512xf32, #tpu.memory_space<vmem>>, vector<1x8x512xf32>
    %47 = vector.shape_cast %46 : vector<1x8x512xf32> to vector<8x512xf32>
    %cst_25 = arith.constant dense<0.000000e+00> : vector<8x512xf32>
    %48 = tpu.matmul %41, %9, %cst_25 {dimension_numbers = #tpu.dot_dimension_numbers<[1], [0], [0], [1], [0, 0, 1, 1], [], []>} : vector<8x128xf32>, vector<128x512xf32>, vector<8x512xf32> -> vector<8x512xf32>
    %49 = arith.addf %47, %48 : vector<8x512xf32>
    %50 = vector.extract_strided_slice %49 {offsets = [0, 0], sizes = [8, 128], strides = [1, 1]} : vector<8x512xf32> to vector<8x128xf32>
    %51 = arith.negf %50 : vector<8x128xf32>
    %52 = math.exp %51 : vector<8x128xf32>
    %cst_26 = arith.constant 1.000000e+00 : f32
    %53 = vector.broadcast %cst_26 : f32 to vector<8x128xf32>
    %54 = arith.addf %53, %52 : vector<8x128xf32>
    %55 = arith.divf %53, %54 : vector<8x128xf32>
    %56 = vector.extract_strided_slice %49 {offsets = [0, 128], sizes = [8, 128], strides = [1, 1]} : vector<8x512xf32> to vector<8x128xf32>
    %57 = arith.negf %56 : vector<8x128xf32>
    %58 = math.exp %57 : vector<8x128xf32>
    %cst_27 = arith.constant 1.000000e+00 : f32
    %59 = vector.broadcast %cst_27 : f32 to vector<8x128xf32>
    %60 = arith.addf %59, %58 : vector<8x128xf32>
    %61 = arith.divf %59, %60 : vector<8x128xf32>
    %62 = vector.extract_strided_slice %49 {offsets = [0, 256], sizes = [8, 128], strides = [1, 1]} : vector<8x512xf32> to vector<8x128xf32>
    %63 = math.tanh %62 : vector<8x128xf32>
    %64 = vector.extract_strided_slice %49 {offsets = [0, 384], sizes = [8, 128], strides = [1, 1]} : vector<8x512xf32> to vector<8x128xf32>
    %65 = arith.negf %64 : vector<8x128xf32>
    %66 = math.exp %65 : vector<8x128xf32>
    %cst_28 = arith.constant 1.000000e+00 : f32
    %67 = vector.broadcast %cst_28 : f32 to vector<8x128xf32>
    %68 = arith.addf %67, %66 : vector<8x128xf32>
    %69 = arith.divf %67, %68 : vector<8x128xf32>
    %70 = arith.mulf %61, %39 : vector<8x128xf32>
    %71 = arith.mulf %55, %63 : vector<8x128xf32>
    %72 = arith.addf %70, %71 : vector<8x128xf32>
    %73 = math.tanh %72 : vector<8x128xf32>
    %74 = arith.mulf %69, %73 : vector<8x128xf32>
    %75 = vector.shape_cast %74 : vector<8x128xf32> to vector<1x8x128xf32>
    %76 = arith.index_cast %c1_i32 : i32 to index
    %c0_29 = arith.constant 0 : index
    %c0_30 = arith.constant 0 : index
    %77 = vector.load %arg7[%76, %c0_29, %c0_30] : memref<8x8x128xf32, #tpu.memory_space<vmem>>, vector<1x8x128xf32>
    tpu.vector_store %arg7[%76, %c0_29, %c0_30], %75 {strides = array<i32>} : memref<8x8x128xf32, #tpu.memory_space<vmem>>, vector<1x8x128xf32>,
    %c2_i32 = arith.constant 2 : i32
    %78 = arith.index_cast %c2_i32 : i32 to index
    %c0_31 = arith.constant 0 : index
    %c0_32 = arith.constant 0 : index
    %79 = vector.load %arg6[%78, %c0_31, %c0_32] : memref<8x8x512xf32, #tpu.memory_space<vmem>>, vector<1x8x512xf32>
    %80 = vector.shape_cast %79 : vector<1x8x512xf32> to vector<8x512xf32>
    %cst_33 = arith.constant dense<0.000000e+00> : vector<8x512xf32>
    %81 = tpu.matmul %74, %9, %cst_33 {dimension_numbers = #tpu.dot_dimension_numbers<[1], [0], [0], [1], [0, 0, 1, 1], [], []>} : vector<8x128xf32>, vector<128x512xf32>, vector<8x512xf32> -> vector<8x512xf32>
    %82 = arith.addf %80, %81 : vector<8x512xf32>
    %83 = vector.extract_strided_slice %82 {offsets = [0, 0], sizes = [8, 128], strides = [1, 1]} : vector<8x512xf32> to vector<8x128xf32>
    %84 = arith.negf %83 : vector<8x128xf32>
    %85 = math.exp %84 : vector<8x128xf32>
    %cst_34 = arith.constant 1.000000e+00 : f32
    %86 = vector.broadcast %cst_34 : f32 to vector<8x128xf32>
    %87 = arith.addf %86, %85 : vector<8x128xf32>
    %88 = arith.divf %86, %87 : vector<8x128xf32>
    %89 = vector.extract_strided_slice %82 {offsets = [0, 128], sizes = [8, 128], strides = [1, 1]} : vector<8x512xf32> to vector<8x128xf32>
    %90 = arith.negf %89 : vector<8x128xf32>
    %91 = math.exp %90 : vector<8x128xf32>
    %cst_35 = arith.constant 1.000000e+00 : f32
    %92 = vector.broadcast %cst_35 : f32 to vector<8x128xf32>
    %93 = arith.addf %92, %91 : vector<8x128xf32>
    %94 = arith.divf %92, %93 : vector<8x128xf32>
    %95 = vector.extract_strided_slice %82 {offsets = [0, 256], sizes = [8, 128], strides = [1, 1]} : vector<8x512xf32> to vector<8x128xf32>
    %96 = math.tanh %95 : vector<8x128xf32>
    %97 = vector.extract_strided_slice %82 {offsets = [0, 384], sizes = [8, 128], strides = [1, 1]} : vector<8x512xf32> to vector<8x128xf32>
    %98 = arith.negf %97 : vector<8x128xf32>
    %99 = math.exp %98 : vector<8x128xf32>
    %cst_36 = arith.constant 1.000000e+00 : f32
    %100 = vector.broadcast %cst_36 : f32 to vector<8x128xf32>
    %101 = arith.addf %100, %99 : vector<8x128xf32>
    %102 = arith.divf %100, %101 : vector<8x128xf32>
    %103 = arith.mulf %94, %72 : vector<8x128xf32>
    %104 = arith.mulf %88, %96 : vector<8x128xf32>
    %105 = arith.addf %103, %104 : vector<8x128xf32>
    %106 = math.tanh %105 : vector<8x128xf32>
    %107 = arith.mulf %102, %106 : vector<8x128xf32>
    %108 = vector.shape_cast %107 : vector<8x128xf32> to vector<1x8x128xf32>
    %109 = arith.index_cast %c2_i32 : i32 to index
    %c0_37 = arith.constant 0 : index
    %c0_38 = arith.constant 0 : index
    %110 = vector.load %arg7[%109, %c0_37, %c0_38] : memref<8x8x128xf32, #tpu.memory_space<vmem>>, vector<1x8x128xf32>
    tpu.vector_store %arg7[%109, %c0_37, %c0_38], %108 {strides = array<i32>} : memref<8x8x128xf32, #tpu.memory_space<vmem>>, vector<1x8x128xf32>,
    %c3_i32 = arith.constant 3 : i32
    %111 = arith.index_cast %c3_i32 : i32 to index
    %c0_39 = arith.constant 0 : index
    %c0_40 = arith.constant 0 : index
    %112 = vector.load %arg6[%111, %c0_39, %c0_40] : memref<8x8x512xf32, #tpu.memory_space<vmem>>, vector<1x8x512xf32>
    %113 = vector.shape_cast %112 : vector<1x8x512xf32> to vector<8x512xf32>
    %cst_41 = arith.constant dense<0.000000e+00> : vector<8x512xf32>
    %114 = tpu.matmul %107, %9, %cst_41 {dimension_numbers = #tpu.dot_dimension_numbers<[1], [0], [0], [1], [0, 0, 1, 1], [], []>} : vector<8x128xf32>, vector<128x512xf32>, vector<8x512xf32> -> vector<8x512xf32>
    %115 = arith.addf %113, %114 : vector<8x512xf32>
    %116 = vector.extract_strided_slice %115 {offsets = [0, 0], sizes = [8, 128], strides = [1, 1]} : vector<8x512xf32> to vector<8x128xf32>
    %117 = arith.negf %116 : vector<8x128xf32>
    %118 = math.exp %117 : vector<8x128xf32>
    %cst_42 = arith.constant 1.000000e+00 : f32
    %119 = vector.broadcast %cst_42 : f32 to vector<8x128xf32>
    %120 = arith.addf %119, %118 : vector<8x128xf32>
    %121 = arith.divf %119, %120 : vector<8x128xf32>
    %122 = vector.extract_strided_slice %115 {offsets = [0, 128], sizes = [8, 128], strides = [1, 1]} : vector<8x512xf32> to vector<8x128xf32>
    %123 = arith.negf %122 : vector<8x128xf32>
    %124 = math.exp %123 : vector<8x128xf32>
    %cst_43 = arith.constant 1.000000e+00 : f32
    %125 = vector.broadcast %cst_43 : f32 to vector<8x128xf32>
    %126 = arith.addf %125, %124 : vector<8x128xf32>
    %127 = arith.divf %125, %126 : vector<8x128xf32>
    %128 = vector.extract_strided_slice %115 {offsets = [0, 256], sizes = [8, 128], strides = [1, 1]} : vector<8x512xf32> to vector<8x128xf32>
    %129 = math.tanh %128 : vector<8x128xf32>
    %130 = vector.extract_strided_slice %115 {offsets = [0, 384], sizes = [8, 128], strides = [1, 1]} : vector<8x512xf32> to vector<8x128xf32>
    %131 = arith.negf %130 : vector<8x128xf32>
    %132 = math.exp %131 : vector<8x128xf32>
    %cst_44 = arith.constant 1.000000e+00 : f32
    %133 = vector.broadcast %cst_44 : f32 to vector<8x128xf32>
    %134 = arith.addf %133, %132 : vector<8x128xf32>
    %135 = arith.divf %133, %134 : vector<8x128xf32>
    %136 = arith.mulf %127, %105 : vector<8x128xf32>
    %137 = arith.mulf %121, %129 : vector<8x128xf32>
    %138 = arith.addf %136, %137 : vector<8x128xf32>
    %139 = math.tanh %138 : vector<8x128xf32>
    %140 = arith.mulf %135, %139 : vector<8x128xf32>
    %141 = vector.shape_cast %140 : vector<8x128xf32> to vector<1x8x128xf32>
    %142 = arith.index_cast %c3_i32 : i32 to index
    %c0_45 = arith.constant 0 : index
    %c0_46 = arith.constant 0 : index
    %143 = vector.load %arg7[%142, %c0_45, %c0_46] : memref<8x8x128xf32, #tpu.memory_space<vmem>>, vector<1x8x128xf32>
    tpu.vector_store %arg7[%142, %c0_45, %c0_46], %141 {strides = array<i32>} : memref<8x8x128xf32, #tpu.memory_space<vmem>>, vector<1x8x128xf32>,
    %c4_i32 = arith.constant 4 : i32
    %144 = arith.index_cast %c4_i32 : i32 to index
    %c0_47 = arith.constant 0 : index
    %c0_48 = arith.constant 0 : index
    %145 = vector.load %arg6[%144, %c0_47, %c0_48] : memref<8x8x512xf32, #tpu.memory_space<vmem>>, vector<1x8x512xf32>
    %146 = vector.shape_cast %145 : vector<1x8x512xf32> to vector<8x512xf32>
    %cst_49 = arith.constant dense<0.000000e+00> : vector<8x512xf32>
    %147 = tpu.matmul %140, %9, %cst_49 {dimension_numbers = #tpu.dot_dimension_numbers<[1], [0], [0], [1], [0, 0, 1, 1], [], []>} : vector<8x128xf32>, vector<128x512xf32>, vector<8x512xf32> -> vector<8x512xf32>
    %148 = arith.addf %146, %147 : vector<8x512xf32>
    %149 = vector.extract_strided_slice %148 {offsets = [0, 0], sizes = [8, 128], strides = [1, 1]} : vector<8x512xf32> to vector<8x128xf32>
    %150 = arith.negf %149 : vector<8x128xf32>
    %151 = math.exp %150 : vector<8x128xf32>
    %cst_50 = arith.constant 1.000000e+00 : f32
    %152 = vector.broadcast %cst_50 : f32 to vector<8x128xf32>
    %153 = arith.addf %152, %151 : vector<8x128xf32>
    %154 = arith.divf %152, %153 : vector<8x128xf32>
    %155 = vector.extract_strided_slice %148 {offsets = [0, 128], sizes = [8, 128], strides = [1, 1]} : vector<8x512xf32> to vector<8x128xf32>
    %156 = arith.negf %155 : vector<8x128xf32>
    %157 = math.exp %156 : vector<8x128xf32>
    %cst_51 = arith.constant 1.000000e+00 : f32
    %158 = vector.broadcast %cst_51 : f32 to vector<8x128xf32>
    %159 = arith.addf %158, %157 : vector<8x128xf32>
    %160 = arith.divf %158, %159 : vector<8x128xf32>
    %161 = vector.extract_strided_slice %148 {offsets = [0, 256], sizes = [8, 128], strides = [1, 1]} : vector<8x512xf32> to vector<8x128xf32>
    %162 = math.tanh %161 : vector<8x128xf32>
    %163 = vector.extract_strided_slice %148 {offsets = [0, 384], sizes = [8, 128], strides = [1, 1]} : vector<8x512xf32> to vector<8x128xf32>
    %164 = arith.negf %163 : vector<8x128xf32>
    %165 = math.exp %164 : vector<8x128xf32>
    %cst_52 = arith.constant 1.000000e+00 : f32
    %166 = vector.broadcast %cst_52 : f32 to vector<8x128xf32>
    %167 = arith.addf %166, %165 : vector<8x128xf32>
    %168 = arith.divf %166, %167 : vector<8x128xf32>
    %169 = arith.mulf %160, %138 : vector<8x128xf32>
    %170 = arith.mulf %154, %162 : vector<8x128xf32>
    %171 = arith.addf %169, %170 : vector<8x128xf32>
    %172 = math.tanh %171 : vector<8x128xf32>
    %173 = arith.mulf %168, %172 : vector<8x128xf32>
    %174 = vector.shape_cast %173 : vector<8x128xf32> to vector<1x8x128xf32>
    %175 = arith.index_cast %c4_i32 : i32 to index
    %c0_53 = arith.constant 0 : index
    %c0_54 = arith.constant 0 : index
    %176 = vector.load %arg7[%175, %c0_53, %c0_54] : memref<8x8x128xf32, #tpu.memory_space<vmem>>, vector<1x8x128xf32>
    tpu.vector_store %arg7[%175, %c0_53, %c0_54], %174 {strides = array<i32>} : memref<8x8x128xf32, #tpu.memory_space<vmem>>, vector<1x8x128xf32>,
    %c5_i32 = arith.constant 5 : i32
    %177 = arith.index_cast %c5_i32 : i32 to index
    %c0_55 = arith.constant 0 : index
    %c0_56 = arith.constant 0 : index
    %178 = vector.load %arg6[%177, %c0_55, %c0_56] : memref<8x8x512xf32, #tpu.memory_space<vmem>>, vector<1x8x512xf32>
    %179 = vector.shape_cast %178 : vector<1x8x512xf32> to vector<8x512xf32>
    %cst_57 = arith.constant dense<0.000000e+00> : vector<8x512xf32>
    %180 = tpu.matmul %173, %9, %cst_57 {dimension_numbers = #tpu.dot_dimension_numbers<[1], [0], [0], [1], [0, 0, 1, 1], [], []>} : vector<8x128xf32>, vector<128x512xf32>, vector<8x512xf32> -> vector<8x512xf32>
    %181 = arith.addf %179, %180 : vector<8x512xf32>
    %182 = vector.extract_strided_slice %181 {offsets = [0, 0], sizes = [8, 128], strides = [1, 1]} : vector<8x512xf32> to vector<8x128xf32>
    %183 = arith.negf %182 : vector<8x128xf32>
    %184 = math.exp %183 : vector<8x128xf32>
    %cst_58 = arith.constant 1.000000e+00 : f32
    %185 = vector.broadcast %cst_58 : f32 to vector<8x128xf32>
    %186 = arith.addf %185, %184 : vector<8x128xf32>
    %187 = arith.divf %185, %186 : vector<8x128xf32>
    %188 = vector.extract_strided_slice %181 {offsets = [0, 128], sizes = [8, 128], strides = [1, 1]} : vector<8x512xf32> to vector<8x128xf32>
    %189 = arith.negf %188 : vector<8x128xf32>
    %190 = math.exp %189 : vector<8x128xf32>
    %cst_59 = arith.constant 1.000000e+00 : f32
    %191 = vector.broadcast %cst_59 : f32 to vector<8x128xf32>
    %192 = arith.addf %191, %190 : vector<8x128xf32>
    %193 = arith.divf %191, %192 : vector<8x128xf32>
    %194 = vector.extract_strided_slice %181 {offsets = [0, 256], sizes = [8, 128], strides = [1, 1]} : vector<8x512xf32> to vector<8x128xf32>
    %195 = math.tanh %194 : vector<8x128xf32>
    %196 = vector.extract_strided_slice %181 {offsets = [0, 384], sizes = [8, 128], strides = [1, 1]} : vector<8x512xf32> to vector<8x128xf32>
    %197 = arith.negf %196 : vector<8x128xf32>
    %198 = math.exp %197 : vector<8x128xf32>
    %cst_60 = arith.constant 1.000000e+00 : f32
    %199 = vector.broadcast %cst_60 : f32 to vector<8x128xf32>
    %200 = arith.addf %199, %198 : vector<8x128xf32>
    %201 = arith.divf %199, %200 : vector<8x128xf32>
    %202 = arith.mulf %193, %171 : vector<8x128xf32>
    %203 = arith.mulf %187, %195 : vector<8x128xf32>
    %204 = arith.addf %202, %203 : vector<8x128xf32>
    %205 = math.tanh %204 : vector<8x128xf32>
    %206 = arith.mulf %201, %205 : vector<8x128xf32>
    %207 = vector.shape_cast %206 : vector<8x128xf32> to vector<1x8x128xf32>
    %208 = arith.index_cast %c5_i32 : i32 to index
    %c0_61 = arith.constant 0 : index
    %c0_62 = arith.constant 0 : index
    %209 = vector.load %arg7[%208, %c0_61, %c0_62] : memref<8x8x128xf32, #tpu.memory_space<vmem>>, vector<1x8x128xf32>
    tpu.vector_store %arg7[%208, %c0_61, %c0_62], %207 {strides = array<i32>} : memref<8x8x128xf32, #tpu.memory_space<vmem>>, vector<1x8x128xf32>,
    %c6_i32 = arith.constant 6 : i32
    %210 = arith.index_cast %c6_i32 : i32 to index
    %c0_63 = arith.constant 0 : index
    %c0_64 = arith.constant 0 : index
    %211 = vector.load %arg6[%210, %c0_63, %c0_64] : memref<8x8x512xf32, #tpu.memory_space<vmem>>, vector<1x8x512xf32>
    %212 = vector.shape_cast %211 : vector<1x8x512xf32> to vector<8x512xf32>
    %cst_65 = arith.constant dense<0.000000e+00> : vector<8x512xf32>
    %213 = tpu.matmul %206, %9, %cst_65 {dimension_numbers = #tpu.dot_dimension_numbers<[1], [0], [0], [1], [0, 0, 1, 1], [], []>} : vector<8x128xf32>, vector<128x512xf32>, vector<8x512xf32> -> vector<8x512xf32>
    %214 = arith.addf %212, %213 : vector<8x512xf32>
    %215 = vector.extract_strided_slice %214 {offsets = [0, 0], sizes = [8, 128], strides = [1, 1]} : vector<8x512xf32> to vector<8x128xf32>
    %216 = arith.negf %215 : vector<8x128xf32>
    %217 = math.exp %216 : vector<8x128xf32>
    %cst_66 = arith.constant 1.000000e+00 : f32
    %218 = vector.broadcast %cst_66 : f32 to vector<8x128xf32>
    %219 = arith.addf %218, %217 : vector<8x128xf32>
    %220 = arith.divf %218, %219 : vector<8x128xf32>
    %221 = vector.extract_strided_slice %214 {offsets = [0, 128], sizes = [8, 128], strides = [1, 1]} : vector<8x512xf32> to vector<8x128xf32>
    %222 = arith.negf %221 : vector<8x128xf32>
    %223 = math.exp %222 : vector<8x128xf32>
    %cst_67 = arith.constant 1.000000e+00 : f32
    %224 = vector.broadcast %cst_67 : f32 to vector<8x128xf32>
    %225 = arith.addf %224, %223 : vector<8x128xf32>
    %226 = arith.divf %224, %225 : vector<8x128xf32>
    %227 = vector.extract_strided_slice %214 {offsets = [0, 256], sizes = [8, 128], strides = [1, 1]} : vector<8x512xf32> to vector<8x128xf32>
    %228 = math.tanh %227 : vector<8x128xf32>
    %229 = vector.extract_strided_slice %214 {offsets = [0, 384], sizes = [8, 128], strides = [1, 1]} : vector<8x512xf32> to vector<8x128xf32>
    %230 = arith.negf %229 : vector<8x128xf32>
    %231 = math.exp %230 : vector<8x128xf32>
    %cst_68 = arith.constant 1.000000e+00 : f32
    %232 = vector.broadcast %cst_68 : f32 to vector<8x128xf32>
    %233 = arith.addf %232, %231 : vector<8x128xf32>
    %234 = arith.divf %232, %233 : vector<8x128xf32>
    %235 = arith.mulf %226, %204 : vector<8x128xf32>
    %236 = arith.mulf %220, %228 : vector<8x128xf32>
    %237 = arith.addf %235, %236 : vector<8x128xf32>
    %238 = math.tanh %237 : vector<8x128xf32>
    %239 = arith.mulf %234, %238 : vector<8x128xf32>
    %240 = vector.shape_cast %239 : vector<8x128xf32> to vector<1x8x128xf32>
    %241 = arith.index_cast %c6_i32 : i32 to index
    %c0_69 = arith.constant 0 : index
    %c0_70 = arith.constant 0 : index
    %242 = vector.load %arg7[%241, %c0_69, %c0_70] : memref<8x8x128xf32, #tpu.memory_space<vmem>>, vector<1x8x128xf32>
    tpu.vector_store %arg7[%241, %c0_69, %c0_70], %240 {strides = array<i32>} : memref<8x8x128xf32, #tpu.memory_space<vmem>>, vector<1x8x128xf32>,
    %c7_i32 = arith.constant 7 : i32
    %243 = arith.index_cast %c7_i32 : i32 to index
    %c0_71 = arith.constant 0 : index
    %c0_72 = arith.constant 0 : index
    %244 = vector.load %arg6[%243, %c0_71, %c0_72] : memref<8x8x512xf32, #tpu.memory_space<vmem>>, vector<1x8x512xf32>
    %245 = vector.shape_cast %244 : vector<1x8x512xf32> to vector<8x512xf32>
    %cst_73 = arith.constant dense<0.000000e+00> : vector<8x512xf32>
    %246 = tpu.matmul %239, %9, %cst_73 {dimension_numbers = #tpu.dot_dimension_numbers<[1], [0], [0], [1], [0, 0, 1, 1], [], []>} : vector<8x128xf32>, vector<128x512xf32>, vector<8x512xf32> -> vector<8x512xf32>
    %247 = arith.addf %245, %246 : vector<8x512xf32>
    %248 = vector.extract_strided_slice %247 {offsets = [0, 0], sizes = [8, 128], strides = [1, 1]} : vector<8x512xf32> to vector<8x128xf32>
    %249 = arith.negf %248 : vector<8x128xf32>
    %250 = math.exp %249 : vector<8x128xf32>
    %cst_74 = arith.constant 1.000000e+00 : f32
    %251 = vector.broadcast %cst_74 : f32 to vector<8x128xf32>
    %252 = arith.addf %251, %250 : vector<8x128xf32>
    %253 = arith.divf %251, %252 : vector<8x128xf32>
    %254 = vector.extract_strided_slice %247 {offsets = [0, 128], sizes = [8, 128], strides = [1, 1]} : vector<8x512xf32> to vector<8x128xf32>
    %255 = arith.negf %254 : vector<8x128xf32>
    %256 = math.exp %255 : vector<8x128xf32>
    %cst_75 = arith.constant 1.000000e+00 : f32
    %257 = vector.broadcast %cst_75 : f32 to vector<8x128xf32>
    %258 = arith.addf %257, %256 : vector<8x128xf32>
    %259 = arith.divf %257, %258 : vector<8x128xf32>
    %260 = vector.extract_strided_slice %247 {offsets = [0, 256], sizes = [8, 128], strides = [1, 1]} : vector<8x512xf32> to vector<8x128xf32>
    %261 = math.tanh %260 : vector<8x128xf32>
    %262 = vector.extract_strided_slice %247 {offsets = [0, 384], sizes = [8, 128], strides = [1, 1]} : vector<8x512xf32> to vector<8x128xf32>
    %263 = arith.negf %262 : vector<8x128xf32>
    %264 = math.exp %263 : vector<8x128xf32>
    %cst_76 = arith.constant 1.000000e+00 : f32
    %265 = vector.broadcast %cst_76 : f32 to vector<8x128xf32>
    %266 = arith.addf %265, %264 : vector<8x128xf32>
    %267 = arith.divf %265, %266 : vector<8x128xf32>
    %268 = arith.mulf %259, %237 : vector<8x128xf32>
    %269 = arith.mulf %253, %261 : vector<8x128xf32>
    %270 = arith.addf %268, %269 : vector<8x128xf32>
    %271 = math.tanh %270 : vector<8x128xf32>
    %272 = arith.mulf %267, %271 : vector<8x128xf32>
    %273 = vector.shape_cast %272 : vector<8x128xf32> to vector<1x8x128xf32>
    %274 = arith.index_cast %c7_i32 : i32 to index
    %c0_77 = arith.constant 0 : index
    %c0_78 = arith.constant 0 : index
    %275 = vector.load %arg7[%274, %c0_77, %c0_78] : memref<8x8x128xf32, #tpu.memory_space<vmem>>, vector<1x8x128xf32>
    tpu.vector_store %arg7[%274, %c0_77, %c0_78], %273 {strides = array<i32>} : memref<8x8x128xf32, #tpu.memory_space<vmem>>, vector<1x8x128xf32>,
    %c8_i32 = arith.constant 8 : i32
    %c0_79 = arith.constant 0 : index
    %c0_80 = arith.constant 0 : index
    %276 = vector.load %arg8[%c0_79, %c0_80] : memref<8x128xf32, #tpu.memory_space<vmem>>, vector<8x128xf32>
    tpu.vector_store %arg8[%c0_79, %c0_80], %272 {strides = array<i32>} : memref<8x128xf32, #tpu.memory_space<vmem>>, vector<8x128xf32>,
    %c0_81 = arith.constant 0 : index
    %c0_82 = arith.constant 0 : index
    %277 = vector.load %arg9[%c0_81, %c0_82] : memref<8x128xf32, #tpu.memory_space<vmem>>, vector<8x128xf32>
    tpu.vector_store %arg9[%c0_81, %c0_82], %270 {strides = array<i32>} : memref<8x128xf32, #tpu.memory_space<vmem>>, vector<8x128xf32>,
    %c0_83 = arith.constant 0 : index
    %c0_84 = arith.constant 0 : index
    %c0_85 = arith.constant 0 : index
    %278 = vector.load %arg7[%c0_83, %c0_84, %c0_85] : memref<8x8x128xf32, #tpu.memory_space<vmem>>, vector<8x1x128xf32>
    %279 = vector.shape_cast %278 : vector<8x1x128xf32> to vector<8x128xf32>
    %c0_86 = arith.constant 0 : index
    %c0_87 = arith.constant 0 : index
    %c0_88 = arith.constant 0 : index
    %280 = vector.load %arg5[%c0_86, %c0_87, %c0_88] : memref<8x8x128xf32, #tpu.memory_space<vmem>>, vector<1x8x128xf32>
    %281 = vector.shape_cast %280 : vector<1x8x128xf32> to vector<8x128xf32>
    %282 = vector.shape_cast %279 : vector<8x128xf32> to vector<1x8x128xf32>
    tpu.vector_store %arg5[%c0_86, %c0_87, %c0_88], %282 {strides = array<i32>} : memref<8x8x128xf32, #tpu.memory_space<vmem>>, vector<1x8x128xf32>,
    %c0_89 = arith.constant 0 : index
    %c1 = arith.constant 1 : index
    %c0_90 = arith.constant 0 : index
    %283 = vector.load %arg7[%c0_89, %c1, %c0_90] : memref<8x8x128xf32, #tpu.memory_space<vmem>>, vector<8x1x128xf32>
    %284 = vector.shape_cast %283 : vector<8x1x128xf32> to vector<8x128xf32>
    %c1_91 = arith.constant 1 : index
    %c0_92 = arith.constant 0 : index
    %c0_93 = arith.constant 0 : index
    %285 = vector.load %arg5[%c1_91, %c0_92, %c0_93] : memref<8x8x128xf32, #tpu.memory_space<vmem>>, vector<1x8x128xf32>
    %286 = vector.shape_cast %285 : vector<1x8x128xf32> to vector<8x128xf32>
    %287 = vector.shape_cast %284 : vector<8x128xf32> to vector<1x8x128xf32>
    tpu.vector_store %arg5[%c1_91, %c0_92, %c0_93], %287 {strides = array<i32>} : memref<8x8x128xf32, #tpu.memory_space<vmem>>, vector<1x8x128xf32>,
    %c0_94 = arith.constant 0 : index
    %c2 = arith.constant 2 : index
    %c0_95 = arith.constant 0 : index
    %288 = vector.load %arg7[%c0_94, %c2, %c0_95] : memref<8x8x128xf32, #tpu.memory_space<vmem>>, vector<8x1x128xf32>
    %289 = vector.shape_cast %288 : vector<8x1x128xf32> to vector<8x128xf32>
    %c2_96 = arith.constant 2 : index
    %c0_97 = arith.constant 0 : index
    %c0_98 = arith.constant 0 : index
    %290 = vector.load %arg5[%c2_96, %c0_97, %c0_98] : memref<8x8x128xf32, #tpu.memory_space<vmem>>, vector<1x8x128xf32>
    %291 = vector.shape_cast %290 : vector<1x8x128xf32> to vector<8x128xf32>
    %292 = vector.shape_cast %289 : vector<8x128xf32> to vector<1x8x128xf32>
    tpu.vector_store %arg5[%c2_96, %c0_97, %c0_98], %292 {strides = array<i32>} : memref<8x8x128xf32, #tpu.memory_space<vmem>>, vector<1x8x128xf32>,
    %c0_99 = arith.constant 0 : index
    %c3 = arith.constant 3 : index
    %c0_100 = arith.constant 0 : index
    %293 = vector.load %arg7[%c0_99, %c3, %c0_100] : memref<8x8x128xf32, #tpu.memory_space<vmem>>, vector<8x1x128xf32>
    %294 = vector.shape_cast %293 : vector<8x1x128xf32> to vector<8x128xf32>
    %c3_101 = arith.constant 3 : index
    %c0_102 = arith.constant 0 : index
    %c0_103 = arith.constant 0 : index
    %295 = vector.load %arg5[%c3_101, %c0_102, %c0_103] : memref<8x8x128xf32, #tpu.memory_space<vmem>>, vector<1x8x128xf32>
    %296 = vector.shape_cast %295 : vector<1x8x128xf32> to vector<8x128xf32>
    %297 = vector.shape_cast %294 : vector<8x128xf32> to vector<1x8x128xf32>
    tpu.vector_store %arg5[%c3_101, %c0_102, %c0_103], %297 {strides = array<i32>} : memref<8x8x128xf32, #tpu.memory_space<vmem>>, vector<1x8x128xf32>,
    %c0_104 = arith.constant 0 : index
    %c4 = arith.constant 4 : index
    %c0_105 = arith.constant 0 : index
    %298 = vector.load %arg7[%c0_104, %c4, %c0_105] : memref<8x8x128xf32, #tpu.memory_space<vmem>>, vector<8x1x128xf32>
    %299 = vector.shape_cast %298 : vector<8x1x128xf32> to vector<8x128xf32>
    %c4_106 = arith.constant 4 : index
    %c0_107 = arith.constant 0 : index
    %c0_108 = arith.constant 0 : index
    %300 = vector.load %arg5[%c4_106, %c0_107, %c0_108] : memref<8x8x128xf32, #tpu.memory_space<vmem>>, vector<1x8x128xf32>
    %301 = vector.shape_cast %300 : vector<1x8x128xf32> to vector<8x128xf32>
    %302 = vector.shape_cast %299 : vector<8x128xf32> to vector<1x8x128xf32>
    tpu.vector_store %arg5[%c4_106, %c0_107, %c0_108], %302 {strides = array<i32>} : memref<8x8x128xf32, #tpu.memory_space<vmem>>, vector<1x8x128xf32>,
    %c0_109 = arith.constant 0 : index
    %c5 = arith.constant 5 : index
    %c0_110 = arith.constant 0 : index
    %303 = vector.load %arg7[%c0_109, %c5, %c0_110] : memref<8x8x128xf32, #tpu.memory_space<vmem>>, vector<8x1x128xf32>
    %304 = vector.shape_cast %303 : vector<8x1x128xf32> to vector<8x128xf32>
    %c5_111 = arith.constant 5 : index
    %c0_112 = arith.constant 0 : index
    %c0_113 = arith.constant 0 : index
    %305 = vector.load %arg5[%c5_111, %c0_112, %c0_113] : memref<8x8x128xf32, #tpu.memory_space<vmem>>, vector<1x8x128xf32>
    %306 = vector.shape_cast %305 : vector<1x8x128xf32> to vector<8x128xf32>
    %307 = vector.shape_cast %304 : vector<8x128xf32> to vector<1x8x128xf32>
    tpu.vector_store %arg5[%c5_111, %c0_112, %c0_113], %307 {strides = array<i32>} : memref<8x8x128xf32, #tpu.memory_space<vmem>>, vector<1x8x128xf32>,
    %c0_114 = arith.constant 0 : index
    %c6 = arith.constant 6 : index
    %c0_115 = arith.constant 0 : index
    %308 = vector.load %arg7[%c0_114, %c6, %c0_115] : memref<8x8x128xf32, #tpu.memory_space<vmem>>, vector<8x1x128xf32>
    %309 = vector.shape_cast %308 : vector<8x1x128xf32> to vector<8x128xf32>
    %c6_116 = arith.constant 6 : index
    %c0_117 = arith.constant 0 : index
    %c0_118 = arith.constant 0 : index
    %310 = vector.load %arg5[%c6_116, %c0_117, %c0_118] : memref<8x8x128xf32, #tpu.memory_space<vmem>>, vector<1x8x128xf32>
    %311 = vector.shape_cast %310 : vector<1x8x128xf32> to vector<8x128xf32>
    %312 = vector.shape_cast %309 : vector<8x128xf32> to vector<1x8x128xf32>
    tpu.vector_store %arg5[%c6_116, %c0_117, %c0_118], %312 {strides = array<i32>} : memref<8x8x128xf32, #tpu.memory_space<vmem>>, vector<1x8x128xf32>,
    %c0_119 = arith.constant 0 : index
    %c7 = arith.constant 7 : index
    %c0_120 = arith.constant 0 : index
    %313 = vector.load %arg7[%c0_119, %c7, %c0_120] : memref<8x8x128xf32, #tpu.memory_space<vmem>>, vector<8x1x128xf32>
    %314 = vector.shape_cast %313 : vector<8x1x128xf32> to vector<8x128xf32>
    %c7_121 = arith.constant 7 : index
    %c0_122 = arith.constant 0 : index
    %c0_123 = arith.constant 0 : index
    %315 = vector.load %arg5[%c7_121, %c0_122, %c0_123] : memref<8x8x128xf32, #tpu.memory_space<vmem>>, vector<1x8x128xf32>
    %316 = vector.shape_cast %315 : vector<1x8x128xf32> to vector<8x128xf32>
    %317 = vector.shape_cast %314 : vector<8x128xf32> to vector<1x8x128xf32>
    tpu.vector_store %arg5[%c7_121, %c0_122, %c0_123], %317 {strides = array<i32>} : memref<8x8x128xf32, #tpu.memory_space<vmem>>, vector<1x8x128xf32>,
    return
  }
  func.func @transform_0(%arg0: i32, %arg1: i32) -> (i32, i32, i32) {
    %c0_i32 = arith.constant 0 : i32
    %c0_i32_0 = arith.constant 0 : i32
    return %arg1, %arg0, %c0_i32 : i32, i32, i32
  }
  func.func @transform_1(%arg0: i32, %arg1: i32) -> (i32, i32) {
    %c0_i32 = arith.constant 0 : i32
    %c0_i32_0 = arith.constant 0 : i32
    %c0_i32_1 = arith.constant 0 : i32
    return %c0_i32, %c0_i32_0 : i32, i32
  }
  func.func @transform_2(%arg0: i32, %arg1: i32) -> (i32, i32) {
    %c0_i32 = arith.constant 0 : i32
    %c0_i32_0 = arith.constant 0 : i32
    %c0_i32_1 = arith.constant 0 : i32
    return %c0_i32, %c0_i32_0 : i32, i32
  }
  func.func @transform_3(%arg0: i32, %arg1: i32) -> (i32, i32, i32) {
    %c0_i32 = arith.constant 0 : i32
    %c0_i32_0 = arith.constant 0 : i32
    return %arg0, %arg1, %c0_i32 : i32, i32, i32
  }
}

</mosaic_0001>

<bundles_post_ra>
// kernel: lstm_encoder_forward.1
= control target key start
LH: loop header
LB: loop body
LE: loop exit
PB: predicated region body
PF: predicated region fallthrough
CT: control target
= control target key end

     0   :  { %v3771_v3 = vmov 0.0   ;;  %vm32_vm0 = vcmask 64512   ;;  %vm1814_vm1 = vcmask 1041409   ;;  %vm1817_vm2 = vcmask 1042434   ;;  %s3767_s1 = inlined_call_operand.vmem [shape: f32[8,512], index: 1, kind: input, shape index: {}]   ;;  %s3768_s0 = inlined_call_operand.vmem [shape: f32[8,8,8], index: 0, kind: input, shape index: {}]   ;;  %s3769_s2 = inlined_call_operand.vmem [shape: f32[128,512], index: 2, kind: input, shape index: {}]   ;;  %s3770_s3 = inlined_call_operand.vmem [shape: f32[8,8,128], index: 3, kind: output, shape index: {}]  }
   0x1   :  { %v29_v0 = vld [vmem:[%s3767_s1 + $0x8] sm:$0xff]  ;;  %v31_v1 = vld [vmem:[%s3767_s1 + $0x18] sm:$0xff]  ;;  %v28_v2 = vld [vmem:[%s3767_s1] sm:$0xff]  ;;  %121 = vmatprep.mubr.f32.mxu0 %v3771_v3  ;;  %234 = vmatprep.mubr.f32.mxu1 %v3771_v3  ;;  %vm1820_vm3 = vcmask 1043459   ;;  %vm1823_vm4 = vcmask 1044484   ;;  %vm1826_vm5 = vcmask 1045509  }
   0x2   :  { %87 = vmatprep.subr.mxu0 %v29_v0  ;;  %200 = vmatprep.subr.mxu1 %v31_v1  ;;  %v30_v4 = vld [vmem:[%s3767_s1 + $0x10] sm:$0xff]  ;;  %v20_v5 = vld [vmem:[%s3768_s0] sm:$0xff]  ;;  %v2352_v6 = vld [vmem:[%s3769_s2 + $0x1e8] sm:$0xff]  ;;  %vm1829_vm6 = vcmask 1046534   ;;  %vm1832_vm7 = vcmask 1047559  }
   0x3   :  { %3854 = vst [vmem:[#allocation6_spill] sm:$0xff] %v2352_v6  ;;  %88 = vmatpush1.msra.mxu0 %v28_v2  ;;  %201 = vmatpush1.msra.mxu1 %v30_v4  ;;  %v2357_v7 = vld [vmem:[%s3769_s2 + $0x1f8] sm:$0xff]  ;;  %v2362_v8 = vld [vmem:[%s3769_s2 + $0x1e0] sm:$0xff]  ;;  %v2367_v9 = vld [vmem:[%s3769_s2 + $0x1f0] sm:$0xff] }
   0x4   :  { %3855 = vst [vmem:[#allocation7_spill] sm:$0xff] %v2357_v7  ;;  %2071 = vmatmul.mubr.msk.f32.vlgmr.msra.gmra.mxu0 %vm32_vm0, %v20_v5  ;;  %2079 = vmatmul.mubr.msk.f32.vlgmr.msra.gmra.mxu1 %vm32_vm0, %v20_v5  ;;  %v2374_v10 = vld [vmem:[%s3769_s2 + $0x1c8] sm:$0xff]  ;;  %v2379_v11 = vld [vmem:[%s3769_s2 + $0x1d8] sm:$0xff]  ;;  %v2388_v12 = vld [vmem:[%s3769_s2 + $0x1c0] sm:$0xff] }
   0x5   :  { %385 = vmatprep.subr.mxu0 %v2352_v6  ;;  %456 = vmatprep.subr.mxu1 %v2357_v7  ;;  %v2393_v13 = vld [vmem:[%s3769_s2 + $0x1d0] sm:$0xff]  ;;  %v21_v14 = vld [vmem:[%s3768_s0 + $0x8] sm:$0xff]  ;;  %v2410_v16 = vld [vmem:[%s3769_s2 + $0x1b8] sm:$0xff] }
   0x6   :  { %386 = vmatpush1.msra.mxu0 %v2362_v8  ;;  %457 = vmatpush1.msra.mxu1 %v2367_v9  ;;  %v2405_v15 = vld [vmem:[%s3769_s2 + $0x1a8] sm:$0xff]  ;;  %v2417_v17 = vld [vmem:[%s3769_s2 + $0x1a0] sm:$0xff]  ;;  %v2422_v18 = vld [vmem:[%s3769_s2 + $0x1b0] sm:$0xff] }
   0x7   :  { %387 = vmatprep.subr.mxu0 %v2374_v10  ;;  %458 = vmatprep.subr.mxu1 %v2379_v11  ;;  %v2429_v19 = vld [vmem:[%s3769_s2 + $0x188] sm:$0xff]  ;;  %v2434_v20 = vld [vmem:[%s3769_s2 + $0x198] sm:$0xff]  ;;  %v2443_v21 = vld [vmem:[%s3769_s2 + $0x180] sm:$0xff] }
   0x8   :  { %127 = vmatprep.mubr.f32.mxu0 %v3771_v3  ;;  %240 = vmatprep.mubr.f32.mxu1 %v3771_v3  ;;  %v2448_v22 = vld [vmem:[%s3769_s2 + $0x190] sm:$0xff]  ;;  %v2460_v24 = vld [vmem:[%s3769_s2 + $0x168] sm:$0xff]  ;;  %v2465_v25 = vld [vmem:[%s3769_s2 + $0x178] sm:$0xff] }
   0x9   :  { %388 = vmatpush1.msra.mxu0 %v2388_v12  ;;  %459 = vmatpush1.msra.mxu1 %v2393_v13  ;;  %v22_v23 = vld [vmem:[%s3768_s0 + $0x10] sm:$0xff]  ;;  %v2472_v26 = vld [vmem:[%s3769_s2 + $0x160] sm:$0xff]  ;;  %v2484_v28 = vld [vmem:[%s3769_s2 + $0x148] sm:$0xff] }
   0xa   :  { %2072 = vmatmul.mubr.msk.f32.gmra.mxu0 %vm32_vm0, %v21_v14  ;;  %2080 = vmatmul.mubr.msk.f32.gmra.mxu1 %vm32_vm0, %v21_v14  ;;  %v2477_v27 = vld [vmem:[%s3769_s2 + $0x170] sm:$0xff]  ;;  %v2489_v29 = vld [vmem:[%s3769_s2 + $0x158] sm:$0xff]  ;;  %v2498_v30 = vld [vmem:[%s3769_s2 + $0x140] sm:$0xff] }
   0xb   :  { %389 = vmatprep.subr.mxu0 %v2405_v15  ;;  %460 = vmatprep.subr.mxu1 %v2410_v16  ;;  %v2503_v31 = vld [vmem:[%s3769_s2 + $0x150] sm:$0xff]  ;;  %v23_v32 = vld [vmem:[%s3768_s0 + $0x18] sm:$0xff]  ;;  %v2515_v33 = vld [vmem:[%s3769_s2 + $0x128] sm:$0xff] }
   0xc   :  { %390 = vmatpush1.msra.mxu0 %v2417_v17  ;;  %461 = vmatpush1.msra.mxu1 %v2422_v18  ;;  %v2520_v34 = vld [vmem:[%s3769_s2 + $0x138] sm:$0xff]  ;;  %v2527_v35 = vld [vmem:[%s3769_s2 + $0x120] sm:$0xff]  ;;  %v2532_v36 = vld [vmem:[%s3769_s2 + $0x130] sm:$0xff] }
   0xd   :  { %391 = vmatprep.subr.mxu0 %v2429_v19  ;;  %462 = vmatprep.subr.mxu1 %v2434_v20  ;;  %v2539_v37 = vld [vmem:[%s3769_s2 + $0x108] sm:$0xff]  ;;  %v2544_v38 = vld [vmem:[%s3769_s2 + $0x118] sm:$0xff]  ;;  %v2553_v39 = vld [vmem:[%s3769_s2 + $0x100] sm:$0xff] }
   0xe   :  { %133 = vmatprep.mubr.f32.mxu0 %v3771_v3  ;;  %246 = vmatprep.mubr.f32.mxu1 %v3771_v3  ;;  %v2558_v40 = vld [vmem:[%s3769_s2 + $0x110] sm:$0xff]  ;;  %v24_v41 = vld [vmem:[%s3768_s0 + $0x20] sm:$0xff]  ;;  %v2570_v42 = vld [vmem:[%s3769_s2 + $0xe8] sm:$0xff] }
   0xf   :  { %392 = vmatpush1.msra.mxu0 %v2443_v21  ;;  %463 = vmatpush1.msra.mxu1 %v2448_v22  ;;  %v2575_v43 = vld [vmem:[%s3769_s2 + $0xf8] sm:$0xff]  ;;  %v2582_v44 = vld [vmem:[%s3769_s2 + $0xe0] sm:$0xff]  ;;  %v2587_v45 = vld [vmem:[%s3769_s2 + $0xf0] sm:$0xff] }
  0x10   :  { %2073 = vmatmul.mubr.msk.f32.gmra.mxu0 %vm32_vm0, %v22_v23  ;;  %2081 = vmatmul.mubr.msk.f32.gmra.mxu1 %vm32_vm0, %v22_v23  ;;  %v2594_v46 = vld [vmem:[%s3769_s2 + $0xc8] sm:$0xff]  ;;  %v2599_v47 = vld [vmem:[%s3769_s2 + $0xd8] sm:$0xff]  ;;  %v2608_v48 = vld [vmem:[%s3769_s2 + $0xc0] sm:$0xff] }
  0x11   :  { %393 = vmatprep.subr.mxu0 %v2460_v24  ;;  %464 = vmatprep.subr.mxu1 %v2465_v25  ;;  %v2613_v49 = vld [vmem:[%s3769_s2 + $0xd0] sm:$0xff]  ;;  %v25_v50 = vld [vmem:[%s3768_s0 + $0x28] sm:$0xff]  ;;  %v2630_v52 = vld [vmem:[%s3769_s2 + $0xb8] sm:$0xff] }
  0x12   :  { %394 = vmatpush1.msra.mxu0 %v2472_v26  ;;  %465 = vmatpush1.msra.mxu1 %v2477_v27  ;;  %v2625_v51 = vld [vmem:[%s3769_s2 + $0xa8] sm:$0xff]  ;;  %v2637_v53 = vld [vmem:[%s3769_s2 + $0xa0] sm:$0xff]  ;;  %v2642_v54 = vld [vmem:[%s3769_s2 + $0xb0] sm:$0xff] }
  0x13   :  { %395 = vmatprep.subr.mxu0 %v2484_v28  ;;  %466 = vmatprep.subr.mxu1 %v2489_v29  ;;  %v2649_v55 = vld [vmem:[%s3769_s2 + $0x88] sm:$0xff]  ;;  %v2654_v56 = vld [vmem:[%s3769_s2 + $0x98] sm:$0xff]  ;;  %v2663_v57 = vld [vmem:[%s3769_s2 + $0x80] sm:$0xff] }
  0x14   :  { %139 = vmatprep.mubr.f32.mxu0 %v3771_v3  ;;  %252 = vmatprep.mubr.f32.mxu1 %v3771_v3  ;;  %3856 = vst [vmem:[#allocation8_spill] sm:$0xff] %v2663_v57  ;;  %v2668_v58 = vld [vmem:[%s3769_s2 + $0x90] sm:$0xff]  ;;  %v2680_v60 = vld [vmem:[%s3769_s2 + $0x68] sm:$0xff]  ;;  %v2685_v61 = vld [vmem:[%s3769_s2 + $0x78] sm:$0xff] }
  0x15   :  { %396 = vmatpush1.msra.mxu0 %v2498_v30  ;;  %467 = vmatpush1.msra.mxu1 %v2503_v31  ;;  %3857 = vst [vmem:[#allocation9_spill] sm:$0xff] %v2668_v58  ;;  %v26_v59 = vld [vmem:[%s3768_s0 + $0x30] sm:$0xff]  ;;  %3858 = vst [vmem:[#allocation10_spill] sm:$0xff] %v2680_v60  ;;  %v2692_v62 = vld [vmem:[%s3769_s2 + $0x60] sm:$0xff] }
  0x16   :  { %2074 = vmatmul.mubr.msk.f32.gmra.mxu0 %vm32_vm0, %v23_v32  ;;  %2082 = vmatmul.mubr.msk.f32.gmra.mxu1 %vm32_vm0, %v23_v32  ;;  %3859 = vst [vmem:[#allocation11_spill] sm:$0xff] %v2685_v61  ;;  %3860 = vst [vmem:[#allocation12_spill] sm:$0xff] %v2692_v62  ;;  %v2697_v63 = vld [vmem:[%s3769_s2 + $0x70] sm:$0xff]  ;;  %v2704_v0 = vld [vmem:[%s3769_s2 + $0x48] sm:$0xff] }
  0x17   :  { %397 = vmatprep.subr.mxu0 %v2515_v33  ;;  %468 = vmatprep.subr.mxu1 %v2520_v34  ;;  %3861 = vst [vmem:[#allocation13_spill] sm:$0xff] %v2697_v63  ;;  %3862 = vst [vmem:[#allocation14_spill] sm:$0xff] %v2704_v0  ;;  %v2709_v1 = vld [vmem:[%s3769_s2 + $0x58] sm:$0xff]  ;;  %v2718_v2 = vld [vmem:[%s3769_s2 + $0x40] sm:$0xff] }
  0x18   :  { %398 = vmatpush1.msra.mxu0 %v2527_v35  ;;  %469 = vmatpush1.msra.mxu1 %v2532_v36  ;;  %3863 = vst [vmem:[#allocation15_spill] sm:$0xff] %v2709_v1  ;;  %3864 = vst [vmem:[#allocation16_spill] sm:$0xff] %v2718_v2  ;;  %v2723_v4 = vld [vmem:[%s3769_s2 + $0x50] sm:$0xff]  ;;  %v27_v5 = vld [vmem:[%s3768_s0 + $0x38] sm:$0xff] }
  0x19   :  { %399 = vmatprep.subr.mxu0 %v2539_v37  ;;  %470 = vmatprep.subr.mxu1 %v2544_v38  ;;  %3865 = vst [vmem:[#allocation17_spill] sm:$0xff] %v2723_v4  ;;  %v2735_v14 = vld [vmem:[%s3769_s2 + $0x28] sm:$0xff]  ;;  %v2740_v23 = vld [vmem:[%s3769_s2 + $0x38] sm:$0xff]  ;;  %v2747_v32 = vld [vmem:[%s3769_s2 + $0x20] sm:$0xff] }
  0x1a   :  { %145 = vmatprep.mubr.f32.mxu0 %v3771_v3  ;;  %258 = vmatprep.mubr.f32.mxu1 %v3771_v3  ;;  %3866 = vst [vmem:[#allocation18_spill] sm:$0xff] %v2735_v14  ;;  %3867 = vst [vmem:[#allocation19_spill] sm:$0xff] %v2740_v23 }
  0x1b   :  { %400 = vmatpush1.msra.mxu0 %v2553_v39  ;;  %471 = vmatpush1.msra.mxu1 %v2558_v40  ;;  %3868 = vst [vmem:[#allocation20_spill] sm:$0xff] %v2747_v32 }
  0x1c   :  { %2075 = vmatmul.mubr.msk.f32.gmra.mxu0 %vm32_vm0, %v24_v41  ;;  %2083 = vmatmul.mubr.msk.f32.gmra.mxu1 %vm32_vm0, %v24_v41  ;;  %v2752_v41 = vld [vmem:[%s3769_s2 + $0x30] sm:$0xff] }
  0x1d   :  { %401 = vmatprep.subr.mxu0 %v2570_v42  ;;  %472 = vmatprep.subr.mxu1 %v2575_v43  ;;  %3869 = vst [vmem:[#allocation21_spill] sm:$0xff] %v2752_v41 }
  0x1e   :  { %402 = vmatpush1.msra.mxu0 %v2582_v44  ;;  %473 = vmatpush1.msra.mxu1 %v2587_v45 }
  0x1f   :  { %403 = vmatprep.subr.mxu0 %v2594_v46  ;;  %474 = vmatprep.subr.mxu1 %v2599_v47 }
  0x20   :  { %151 = vmatprep.mubr.f32.mxu0 %v3771_v3  ;;  %264 = vmatprep.mubr.f32.mxu1 %v3771_v3 }
  0x21   :  { %404 = vmatpush1.msra.mxu0 %v2608_v48  ;;  %475 = vmatpush1.msra.mxu1 %v2613_v49 }
  0x22   :  { %2076 = vmatmul.mubr.msk.f32.gmra.mxu0 %vm32_vm0, %v25_v50  ;;  %2084 = vmatmul.mubr.msk.f32.gmra.mxu1 %vm32_vm0, %v25_v50  ;;  %v2759_v50 = vld [vmem:[%s3769_s2 + $0x8] sm:$0xff] }
  0x23   :  { %405 = vmatprep.subr.mxu0 %v2625_v51  ;;  %476 = vmatprep.subr.mxu1 %v2630_v52  ;;  %3870 = vst [vmem:[#allocation22_spill] sm:$0xff] %v2759_v50 }
  0x24   :  { %406 = vmatpush1.msra.mxu0 %v2637_v53  ;;  %477 = vmatpush1.msra.mxu1 %v2642_v54 }
  0x25   :  { %407 = vmatprep.subr.mxu0 %v2649_v55  ;;  %478 = vmatprep.subr.mxu1 %v2654_v56 }
  0x26   :  { %157 = vmatprep.mubr.f32.mxu0 %v3771_v3  ;;  %270 = vmatprep.mubr.f32.mxu1 %v3771_v3 }
  0x27   :  { %408 = vmatpush1.msra.mxu0 %v2663_v57  ;;  %479 = vmatpush1.msra.mxu1 %v2668_v58 }
  0x28   :  { %2077 = vmatmul.mubr.msk.f32.gmra.mxu0 %vm32_vm0, %v26_v59  ;;  %2085 = vmatmul.mubr.msk.f32.gmra.mxu1 %vm32_vm0, %v26_v59  ;;  %v2764_v59 = vld [vmem:[%s3769_s2 + $0x18] sm:$0xff] }
  0x29   :  { %409 = vmatprep.subr.mxu0 %v2680_v60  ;;  %480 = vmatprep.subr.mxu1 %v2685_v61  ;;  %3871 = vst [vmem:[#allocation23_spill] sm:$0xff] %v2764_v59 }
  0x2a   :  { %410 = vmatpush1.msra.mxu0 %v2692_v62  ;;  %481 = vmatpush1.msra.mxu1 %v2697_v63 }
  0x2b   :  { %411 = vmatprep.subr.mxu0 %v2704_v0  ;;  %482 = vmatprep.subr.mxu1 %v2709_v1 }
  0x2c   :  { %163 = vmatprep.mubr.f32.mxu0 %v3771_v3  ;;  %276 = vmatprep.mubr.f32.mxu1 %v3771_v3  ;;  %v2771_v3 = vld [vmem:[%s3769_s2] sm:$0xff] }
  0x2d   :  { %412 = vmatpush1.msra.mxu0 %v2718_v2  ;;  %483 = vmatpush1.msra.mxu1 %v2723_v4  ;;  %3872 = vst [vmem:[#allocation24_spill] sm:$0xff] %v2771_v3 }
  0x2e   :  { %2078 = vmatmul.mubr.msk.f32.gmra.mxu0 %vm32_vm0, %v27_v5  ;;  %2086 = vmatmul.mubr.msk.f32.gmra.mxu1 %vm32_vm0, %v27_v5  ;;  %v2778_v5 = vld [vmem:[%s3769_s2 + $0x10] sm:$0xff] }
  0x2f   :  { %413 = vmatprep.subr.mxu0 %v2735_v14  ;;  %484 = vmatprep.subr.mxu1 %v2740_v23  ;;  %3873 = vst [vmem:[#allocation25_spill] sm:$0xff] %v2778_v5  ;;  %v3874_v23 = vmov 0.0  }
  0x30   :  { %414 = vmatpush1.msra.mxu0 %v2747_v32  ;;  %485 = vmatpush1.msra.mxu1 %v2752_v41 }
  0x31   :  { %415 = vmatprep.subr.mxu0 %v2759_v50  ;;  %486 = vmatprep.subr.mxu1 %v2764_v59 }
  0x32   :  { %416 = vmatpush1.msra.mxu0 %v2771_v3  ;;  %449 = vmatprep.mubr.f32.mxu0 %v3874_v23 }
  0x33   :  { %487 = vmatpush1.msra.mxu1 %v2778_v5  ;;  %520 = vmatprep.mubr.f32.mxu1 %v3874_v23 }
  0x34   :  { %450 = vmatmul.mubr.f32.vlgmr.msra.gmra.mxu0 %v3874_v23  ;;  %521 = vmatmul.mubr.f32.vlgmr.msra.gmra.mxu1 %v3874_v23 }
  0x35   :  { %561 = vmatprep.subr.mxu0 %v2352_v6  ;;  %632 = vmatprep.subr.mxu1 %v2357_v7 }
  0x36   :  { %562 = vmatpush1.msra.mxu0 %v2362_v8  ;;  %633 = vmatpush1.msra.mxu1 %v2367_v9 }
  0x37   :  { %563 = vmatprep.subr.mxu0 %v2374_v10  ;;  %634 = vmatprep.subr.mxu1 %v2379_v11 }
  0x38   :  { %564 = vmatpush1.msra.mxu0 %v2388_v12  ;;  %635 = vmatpush1.msra.mxu1 %v2393_v13 }
  0x39   :  { %565 = vmatprep.subr.mxu0 %v2405_v15  ;;  %636 = vmatprep.subr.mxu1 %v2410_v16 }
  0x3a   :  { %566 = vmatpush1.msra.mxu0 %v2417_v17  ;;  %637 = vmatpush1.msra.mxu1 %v2422_v18 }
  0x3b   :  { %567 = vmatprep.subr.mxu0 %v2429_v19  ;;  %638 = vmatprep.subr.mxu1 %v2434_v20 }
  0x3c   :  { %568 = vmatpush1.msra.mxu0 %v2443_v21  ;;  %639 = vmatpush1.msra.mxu1 %v2448_v22 }
  0x3d   :  { %569 = vmatprep.subr.mxu0 %v2460_v24  ;;  %640 = vmatprep.subr.mxu1 %v2465_v25 }
  0x3e   :  { %570 = vmatpush1.msra.mxu0 %v2472_v26  ;;  %641 = vmatpush1.msra.mxu1 %v2477_v27 }
  0x3f   :  { %571 = vmatprep.subr.mxu0 %v2484_v28  ;;  %642 = vmatprep.subr.mxu1 %v2489_v29 }
  0x40   :  { %572 = vmatpush1.msra.mxu0 %v2498_v30  ;;  %643 = vmatpush1.msra.mxu1 %v2503_v31 }
  0x41   :  { %573 = vmatprep.subr.mxu0 %v2515_v33  ;;  %644 = vmatprep.subr.mxu1 %v2520_v34 }
  0x42   :  { %574 = vmatpush1.msra.mxu0 %v2527_v35  ;;  %645 = vmatpush1.msra.mxu1 %v2532_v36 }
  0x43   :  { %575 = vmatprep.subr.mxu0 %v2539_v37  ;;  %646 = vmatprep.subr.mxu1 %v2544_v38 }
  0x44   :  { %576 = vmatpush1.msra.mxu0 %v2553_v39  ;;  %647 = vmatpush1.msra.mxu1 %v2558_v40 }
  0x45   :  { %577 = vmatprep.subr.mxu0 %v2570_v42  ;;  %648 = vmatprep.subr.mxu1 %v2575_v43 }
  0x46   :  { %578 = vmatpush1.msra.mxu0 %v2582_v44  ;;  %649 = vmatpush1.msra.mxu1 %v2587_v45 }
  0x47   :  { %579 = vmatprep.subr.mxu0 %v2594_v46  ;;  %650 = vmatprep.subr.mxu1 %v2599_v47 }
  0x48   :  { %580 = vmatpush1.msra.mxu0 %v2608_v48  ;;  %651 = vmatpush1.msra.mxu1 %v2613_v49 }
  0x49   :  { %581 = vmatprep.subr.mxu0 %v2625_v51  ;;  %652 = vmatprep.subr.mxu1 %v2630_v52 }
  0x4a   :  { %582 = vmatpush1.msra.mxu0 %v2637_v53  ;;  %653 = vmatpush1.msra.mxu1 %v2642_v54 }
  0x4b   :  { %583 = vmatprep.subr.mxu0 %v2649_v55  ;;  %654 = vmatprep.subr.mxu1 %v2654_v56 }
  0x4c   :  { %584 = vmatpush1.msra.mxu0 %v2663_v57  ;;  %655 = vmatpush1.msra.mxu1 %v2668_v58  ;;  %v3875_v57 = vld [vmem:[#allocation19_spill] sm:$0xff] }
  0x4d   :  { %585 = vmatprep.subr.mxu0 %v2680_v60  ;;  %656 = vmatprep.subr.mxu1 %v2685_v61 }
  0x4e   :  { %586 = vmatpush1.msra.mxu0 %v2692_v62  ;;  %657 = vmatpush1.msra.mxu1 %v2697_v63 }
  0x4f   :  { %587 = vmatprep.subr.mxu0 %v2704_v0  ;;  %658 = vmatprep.subr.mxu1 %v2709_v1 }
  0x50   :  { %588 = vmatpush1.msra.mxu0 %v2718_v2  ;;  %659 = vmatpush1.msra.mxu1 %v2723_v4 }
  0x51   :  { %589 = vmatprep.subr.mxu0 %v2735_v14  ;;  %660 = vmatprep.subr.mxu1 %v3875_v57 }
  0x52   :  { %590 = vmatpush1.msra.mxu0 %v2747_v32  ;;  %661 = vmatpush1.msra.mxu1 %v2752_v41 }
  0x53   :  { %591 = vmatprep.subr.mxu0 %v2759_v50  ;;  %662 = vmatprep.subr.mxu1 %v2764_v59 }
  0x54   :  { %592 = vmatpush1.msra.mxu0 %v2771_v3  ;;  %625 = vmatprep.mubr.f32.mxu0 %v3874_v23 }
  0x55   :  { %663 = vmatpush1.msra.mxu1 %v2778_v5  ;;  %696 = vmatprep.mubr.f32.mxu1 %v3874_v23 }
  0x56   :  { %738 = vmatprep.subr.mxu0 %v2352_v6  ;;  %809 = vmatprep.subr.mxu1 %v2357_v7 }
  0xc4   :  { %v123_v57 = vpop.f32.mrf.mxu0  ;;  %v236_v32 = vpop.f32.mrf.mxu1 }
  0xc6   :  { %v125_v14 = vpop.f32.mrf.mxu0  ;;  %v238_v41 = vpop.f32.mrf.mxu1 }
  0xca   :  { %v2856_v4 = vpop.f32.mrf.mxu0  ;;  %v2858_v50 = vpop.f32.mrf.mxu1 }
  0xcb   :  { %3876 = vst [vmem:[#allocation26_spill] sm:$0xff] %v2856_v4  ;;  %3877 = vst [vmem:[#allocation27_spill] sm:$0xff] %v2858_v50 }
  0xcc   :  { %v2860_v59 = vpop.f32.mrf.mxu0  ;;  %v2862_v3 = vpop.f32.mrf.mxu1 }
  0xcd   :  { %3878 = vst [vmem:[#allocation28_spill] sm:$0xff] %v2860_v59  ;;  %3879 = vst [vmem:[#allocation29_spill] sm:$0xff] %v2862_v3 }
  0xd0   :  { %v2864_v2 = vpop.f32.mrf.mxu0  ;;  %v2866_v5 = vpop.f32.mrf.mxu1 }
  0xd1   :  { %3880 = vst [vmem:[#allocation30_spill] sm:$0xff] %v2864_v2  ;;  %3881 = vst [vmem:[#allocation31_spill] sm:$0xff] %v2866_v5 }
  0xd2   :  { %v2868_v23 = vpop.f32.mrf.mxu0  ;;  %v2870_v6 = vpop.f32.mrf.mxu1 }
  0xd3   :  { %3882 = vst [vmem:[#allocation32_spill] sm:$0xff] %v2868_v23  ;;  %3883 = vst [vmem:[#allocation33_spill] sm:$0xff] %v2870_v6 }
  0xd6   :  { %v2872_v7 = vpop.f32.mrf.mxu0  ;;  %v2874_v1 = vpop.f32.mrf.mxu1 }
  0xd7   :  { %3884 = vst [vmem:[#allocation34_spill] sm:$0xff] %v2872_v7  ;;  %3885 = vst [vmem:[#allocation35_spill] sm:$0xff] %v2874_v1 }
  0xd8   :  { %v2876_v0 = vpop.f32.mrf.mxu0  ;;  %v2878_v4 = vpop.f32.mrf.mxu1 }
  0xd9   :  { %3886 = vst [vmem:[#allocation36_spill] sm:$0xff] %v2876_v0  ;;  %3887 = vst [vmem:[#allocation37_spill] sm:$0xff] %v2878_v4 }
  0xdc   :  { %v2880_v50 = vpop.f32.mrf.mxu0  ;;  %v2882_v59 = vpop.f32.mrf.mxu1 }
  0xdd   :  { %3888 = vst [vmem:[#allocation38_spill] sm:$0xff] %v2880_v50  ;;  %3889 = vst [vmem:[#allocation39_spill] sm:$0xff] %v2882_v59 }
  0xde   :  { %v2884_v3 = vpop.f32.mrf.mxu0  ;;  %v2886_v2 = vpop.f32.mrf.mxu1 }
  0xdf   :  { %3890 = vst [vmem:[#allocation40_spill] sm:$0xff] %v2884_v3  ;;  %3891 = vst [vmem:[#allocation41_spill] sm:$0xff] %v2886_v2 }
  0xe2   :  { %v2888_v5 = vpop.f32.mrf.mxu0  ;;  %v2890_v23 = vpop.f32.mrf.mxu1 }
  0xe3   :  { %3892 = vst [vmem:[#allocation42_spill] sm:$0xff] %v2888_v5  ;;  %3893 = vst [vmem:[#allocation43_spill] sm:$0xff] %v2890_v23 }
  0xe4   :  { %v2892_v6 = vpop.f32.mrf.mxu0  ;;  %v2894_v7 = vpop.f32.mrf.mxu1 }
  0xe5   :  { %3894 = vst [vmem:[#allocation44_spill] sm:$0xff] %v2892_v6  ;;  %3895 = vst [vmem:[#allocation45_spill] sm:$0xff] %v2894_v7 }
  0xe8   :  { %v2896_v1 = vpop.f32.mrf.mxu0  ;;  %v2898_v0 = vpop.f32.mrf.mxu1 }
  0xe9   :  { %3896 = vst [vmem:[#allocation46_spill] sm:$0xff] %v2896_v1  ;;  %3897 = vst [vmem:[#allocation47_spill] sm:$0xff] %v2898_v0 }
  0xea   :  { %v2900_v4 = vpop.f32.mrf.mxu0  ;;  %v2902_v50 = vpop.f32.mrf.mxu1 }
  0xeb   :  { %3898 = vst [vmem:[#allocation48_spill] sm:$0xff] %v2900_v4  ;;  %3899 = vst [vmem:[#allocation49_spill] sm:$0xff] %v2902_v50 }
  0xee   :  { %v2904_v59 = vpop.f32.mrf.mxu0  ;;  %v2908_v2 = vpop.f32.mrf.mxu1 }
  0xef   :  { %3900 = vst [vmem:[#allocation50_spill] sm:$0xff] %v2904_v59  ;;  %3902 = vst [vmem:[#allocation52_spill] sm:$0xff] %v2908_v2 }
  0xf0   :  { %v2906_v3 = vpop.f32.mrf.mxu0  ;;  %v2910_v23 = vpop.f32.mrf.mxu1 }
  0xf1   :  { %3901 = vst [vmem:[#allocation51_spill] sm:$0xff] %v2906_v3  ;;  %3903 = vst [vmem:[#allocation53_spill] sm:$0xff] %v2910_v23  ;;  %v3922_v23 = vld [vmem:[#allocation25_spill] sm:$0xff] }
  0xf4   :  { %v451_v5 = vpop.f32.mrf.mxu0  ;;  %v522_v1 = vpop.f32.mrf.mxu1 }
  0xf5   :  { %v527_v6 = vadd.f32 %v451_v5, %v123_v57  ;;  %v529_v59 = vadd.f32 %v522_v1, %v236_v32  ;;  %v3908_v32 = vld [vmem:[#allocation12_spill] sm:$0xff] }
  0xf6   :  { %v453_v63 = vpop.f32.mrf.mxu0  ;;  %v524_v4 = vpop.f32.mrf.mxu1 }
  0xf7   :  { %v2087_v7 = vmul.f32 -1.442695, %v527_v6  ;;  %v528_v62 = vadd.f32 %v453_v63, %v125_v14  ;;  %v530_v61 = vadd.f32 %v524_v4, %v238_v41  ;;  %v3907_v4 = vld [vmem:[#allocation11_spill] sm:$0xff]  ;;  %v3909_v41 = vld [vmem:[#allocation13_spill] sm:$0xff] }
  0xf9   :  { %2119 = vpow2.f32 %v2087_v7  ;;  %v2088_v0 = vmul.f32 -1.442695, %v528_v62  ;;  %v2089_v50 = vmul.f32 -1.442695, %v530_v61 }
  0xfb   :  { %2121 = vpow2.f32 %v2088_v0 }
  0xfc   :  { %2123 = vpow2.f32 %v2089_v50  ;;  %v3910_v50 = vld [vmem:[#allocation14_spill] sm:$0xff] }
 0x106   :  { %v2120_v60 = vpop.eup %2119 }
 0x107   :  { %v534_v58 = vadd.f32 1.0, %v2120_v60 }
 0x108   :  { %v2122_v3 = vpop.eup %2121 }
 0x109   :  { %2125 = vrcp.f32 %v534_v58  ;;  %v540_v2 = vadd.f32 1.0, %v2122_v3  ;;  %v2124_v57 = vpop.eup %2123  ;;  %v3904_v3 = vld [vmem:[#allocation8_spill] sm:$0xff]  ;;  %v3905_v58 = vld [vmem:[#allocation9_spill] sm:$0xff] }
 0x10a   :  { %2127 = vtanh.f32 %v529_v59  ;;  %v547_v7 = vadd.f32 1.0, %v2124_v57  ;;  %v3911_v59 = vld [vmem:[#allocation15_spill] sm:$0xff]  ;;  %v3912_v57 = vld [vmem:[#allocation16_spill] sm:$0xff] }
 0x10b   :  { %2129 = vrcp.f32 %v540_v2  ;;  %v3906_v2 = vld [vmem:[#allocation10_spill] sm:$0xff] }
 0x10c   :  { %2131 = vrcp.f32 %v547_v7  ;;  %v3916_v7 = vld [vmem:[#allocation20_spill] sm:$0xff] }
 0x116   :  { %v2126_v5 = vpop.eup %2125 }
 0x117   :  { %v2128_v6 = vpop.eup %2127 }
 0x118   :  { %v2130_v63 = vpop.eup %2129  ;;  %v551_v62 = vmul.f32 %v2128_v6, %v2126_v5  ;;  %v3913_v5 = vld [vmem:[#allocation17_spill] sm:$0xff]  ;;  %v3914_v6 = vld [vmem:[#allocation18_spill] sm:$0xff] }
 0x119   :  { %v550_v14 = vmul.f32 0.0, %v2130_v63  ;;  %v2132_v61 = vpop.eup %2131  ;;  %v3915_v63 = vld [vmem:[#allocation19_spill] sm:$0xff] }
 0x11b   :  { %v2912_v0 = vadd.f32 %v551_v62, %v550_v14  ;;  %v3917_v14 = vld [vmem:[#allocation21_spill] sm:$0xff]  ;;  %v3918_v62 = vld [vmem:[#allocation22_spill] sm:$0xff] }
 0x11d   :  { %2133 = vtanh.f32 %v2912_v0 }
 0x12a   :  { %v2134_v60 = vpop.eup %2133 }
 0x12b   :  { %v554_v1 = vmul.f32 %v2134_v60, %v2132_v61  ;;  %v3919_v61 = vld [vmem:[#allocation23_spill] sm:$0xff]  ;;  %v3920_v60 = vld [vmem:[#allocation24_spill] sm:$0xff] }
 0x12d   :  { %555 = vst [vmem:[#allocation3] sm:$0xff] %v554_v1  ;;  %626 = vmatmul.mubr.f32.vlgmr.msra.gmra.mxu0 %v554_v1  ;;  %697 = vmatmul.mubr.f32.vlgmr.msra.gmra.mxu1 %v554_v1  ;;  %v3921_v1 = vmov 0.0  }
 0x12e   :  { %739 = vmatpush1.msra.mxu0 %v2362_v8  ;;  %810 = vmatpush1.msra.mxu1 %v2367_v9 }
 0x12f   :  { %740 = vmatprep.subr.mxu0 %v2374_v10  ;;  %811 = vmatprep.subr.mxu1 %v2379_v11 }
 0x130   :  { %741 = vmatpush1.msra.mxu0 %v2388_v12  ;;  %812 = vmatpush1.msra.mxu1 %v2393_v13 }
 0x131   :  { %742 = vmatprep.subr.mxu0 %v2405_v15  ;;  %813 = vmatprep.subr.mxu1 %v2410_v16 }
 0x132   :  { %743 = vmatpush1.msra.mxu0 %v2417_v17  ;;  %814 = vmatpush1.msra.mxu1 %v2422_v18 }
 0x133   :  { %744 = vmatprep.subr.mxu0 %v2429_v19  ;;  %815 = vmatprep.subr.mxu1 %v2434_v20 }
 0x134   :  { %745 = vmatpush1.msra.mxu0 %v2443_v21  ;;  %816 = vmatpush1.msra.mxu1 %v2448_v22 }
 0x135   :  { %746 = vmatprep.subr.mxu0 %v2460_v24  ;;  %817 = vmatprep.subr.mxu1 %v2465_v25 }
 0x136   :  { %747 = vmatpush1.msra.mxu0 %v2472_v26  ;;  %818 = vmatpush1.msra.mxu1 %v2477_v27 }
 0x137   :  { %748 = vmatprep.subr.mxu0 %v2484_v28  ;;  %819 = vmatprep.subr.mxu1 %v2489_v29 }
 0x138   :  { %749 = vmatpush1.msra.mxu0 %v2498_v30  ;;  %820 = vmatpush1.msra.mxu1 %v2503_v31 }
 0x139   :  { %750 = vmatprep.subr.mxu0 %v2515_v33  ;;  %821 = vmatprep.subr.mxu1 %v2520_v34 }
 0x13a   :  { %751 = vmatpush1.msra.mxu0 %v2527_v35  ;;  %822 = vmatpush1.msra.mxu1 %v2532_v36 }
 0x13b   :  { %752 = vmatprep.subr.mxu0 %v2539_v37  ;;  %823 = vmatprep.subr.mxu1 %v2544_v38 }
 0x13c   :  { %753 = vmatpush1.msra.mxu0 %v2553_v39  ;;  %824 = vmatpush1.msra.mxu1 %v2558_v40 }
 0x13d   :  { %754 = vmatprep.subr.mxu0 %v2570_v42  ;;  %825 = vmatprep.subr.mxu1 %v2575_v43 }
 0x13e   :  { %755 = vmatpush1.msra.mxu0 %v2582_v44  ;;  %826 = vmatpush1.msra.mxu1 %v2587_v45 }
 0x13f   :  { %756 = vmatprep.subr.mxu0 %v2594_v46  ;;  %827 = vmatprep.subr.mxu1 %v2599_v47 }
 0x140   :  { %757 = vmatpush1.msra.mxu0 %v2608_v48  ;;  %828 = vmatpush1.msra.mxu1 %v2613_v49 }
 0x141   :  { %758 = vmatprep.subr.mxu0 %v2625_v51  ;;  %829 = vmatprep.subr.mxu1 %v2630_v52 }
 0x142   :  { %759 = vmatpush1.msra.mxu0 %v2637_v53  ;;  %830 = vmatpush1.msra.mxu1 %v2642_v54 }
 0x143   :  { %760 = vmatprep.subr.mxu0 %v2649_v55  ;;  %831 = vmatprep.subr.mxu1 %v2654_v56 }
 0x144   :  { %761 = vmatpush1.msra.mxu0 %v3904_v3  ;;  %832 = vmatpush1.msra.mxu1 %v3905_v58 }
 0x145   :  { %762 = vmatprep.subr.mxu0 %v3906_v2  ;;  %833 = vmatprep.subr.mxu1 %v3907_v4  ;;  %v3928_v2 = vld [vmem:[#allocation27_spill] sm:$0xff] }
 0x146   :  { %763 = vmatpush1.msra.mxu0 %v3908_v32  ;;  %834 = vmatpush1.msra.mxu1 %v3909_v41  ;;  %v3927_v32 = vld [vmem:[#allocation29_spill] sm:$0xff] }
 0x147   :  { %764 = vmatprep.subr.mxu0 %v3910_v50  ;;  %835 = vmatprep.subr.mxu1 %v3911_v59 }
 0x148   :  { %765 = vmatpush1.msra.mxu0 %v3912_v57  ;;  %836 = vmatpush1.msra.mxu1 %v3913_v5  ;;  %v3923_v5 = vld [vmem:[#allocation6_spill] sm:$0xff] }
 0x149   :  { %766 = vmatprep.subr.mxu0 %v3914_v6  ;;  %837 = vmatprep.subr.mxu1 %v3915_v63  ;;  %v3924_v6 = vld [vmem:[#allocation7_spill] sm:$0xff] }
 0x14a   :  { %767 = vmatpush1.msra.mxu0 %v3916_v7  ;;  %838 = vmatpush1.msra.mxu1 %v3917_v14  ;;  %v3925_v7 = vld [vmem:[#allocation26_spill] sm:$0xff] }
 0x14b   :  { %768 = vmatprep.subr.mxu0 %v3918_v62  ;;  %839 = vmatprep.subr.mxu1 %v3919_v61  ;;  %v3926_v62 = vld [vmem:[#allocation28_spill] sm:$0xff] }
 0x14c   :  { %769 = vmatpush1.msra.mxu0 %v3920_v60  ;;  %802 = vmatprep.mubr.f32.mxu0 %v3921_v1 }
 0x14d   :  { %840 = vmatpush1.msra.mxu1 %v3922_v23  ;;  %873 = vmatprep.mubr.f32.mxu1 %v3921_v1 }
 0x14e   :  { %915 = vmatprep.subr.mxu0 %v3923_v5  ;;  %986 = vmatprep.subr.mxu1 %v3924_v6 }
 0x1ed   :  { %v627_v63 = vpop.f32.mrf.mxu0  ;;  %v698_v61 = vpop.f32.mrf.mxu1 }
 0x1ee   :  { %v703_v57 = vadd.f32 %v627_v63, %v3925_v7  ;;  %v705_v5 = vadd.f32 %v698_v61, %v3928_v2  ;;  %v3934_v61 = vld [vmem:[#allocation14_spill] sm:$0xff] }
 0x1ef   :  { %v629_v14 = vpop.f32.mrf.mxu0  ;;  %v700_v41 = vpop.f32.mrf.mxu1 }
 0x1f0   :  { %v2090_v59 = vmul.f32 -1.442695, %v703_v57  ;;  %v704_v50 = vadd.f32 %v629_v14, %v3926_v62  ;;  %v706_v23 = vadd.f32 %v700_v41, %v3927_v32  ;;  %v3931_v41 = vld [vmem:[#allocation11_spill] sm:$0xff] }
 0x1f2   :  { %2135 = vpow2.f32 %v2090_v59  ;;  %v2091_v60 = vmul.f32 -1.442695, %v704_v50  ;;  %v2092_v4 = vmul.f32 -1.442695, %v706_v23 }
 0x1f4   :  { %2137 = vpow2.f32 %v2091_v60 }
 0x1f5   :  { %2139 = vpow2.f32 %v2092_v4 }
 0x1ff   :  { %v2136_v1 = vpop.eup %2135 }
 0x200   :  { %v710_v58 = vadd.f32 1.0, %v2136_v1  ;;  %v3935_v1 = vld [vmem:[#allocation15_spill] sm:$0xff] }
 0x201   :  { %v2138_v6 = vpop.eup %2137 }
 0x202   :  { %2141 = vrcp.f32 %v710_v58  ;;  %v716_v63 = vadd.f32 1.0, %v2138_v6  ;;  %v2140_v57 = vpop.eup %2139  ;;  %v3930_v58 = vld [vmem:[#allocation10_spill] sm:$0xff]  ;;  %v3933_v6 = vld [vmem:[#allocation13_spill] sm:$0xff] }
 0x203   :  { %2143 = vtanh.f32 %v705_v5  ;;  %v723_v50 = vadd.f32 1.0, %v2140_v57  ;;  %v3932_v5 = vld [vmem:[#allocation12_spill] sm:$0xff]  ;;  %v3937_v57 = vld [vmem:[#allocation17_spill] sm:$0xff] }
 0x204   :  { %2145 = vrcp.f32 %v716_v63  ;;  %v3936_v63 = vld [vmem:[#allocation16_spill] sm:$0xff] }
 0x205   :  { %2147 = vrcp.f32 %v723_v50  ;;  %v3941_v50 = vld [vmem:[#allocation21_spill] sm:$0xff] }
 0x20f   :  { %v2142_v7 = vpop.eup %2141 }
 0x210   :  { %v2144_v59 = vpop.eup %2143 }
 0x211   :  { %v2146_v14 = vpop.eup %2145  ;;  %v727_v62 = vmul.f32 %v2144_v59, %v2142_v7  ;;  %v3938_v7 = vld [vmem:[#allocation18_spill] sm:$0xff]  ;;  %v3939_v59 = vld [vmem:[#allocation19_spill] sm:$0xff] }
 0x212   :  { %v726_v60 = vmul.f32 %v2146_v14, %v2912_v0  ;;  %v2148_v23 = vpop.eup %2147  ;;  %v3929_v0 = vld [vmem:[#allocation9_spill] sm:$0xff]  ;;  %v3940_v14 = vld [vmem:[#allocation20_spill] sm:$0xff] }
 0x214   :  { %v2986_v32 = vadd.f32 %v727_v62, %v726_v60  ;;  %v3942_v62 = vld [vmem:[#allocation22_spill] sm:$0xff]  ;;  %v3943_v60 = vld [vmem:[#allocation23_spill] sm:$0xff] }
 0x216   :  { %2149 = vtanh.f32 %v2986_v32 }
 0x223   :  { %v2150_v2 = vpop.eup %2149 }
 0x224   :  { %v730_v4 = vmul.f32 %v2150_v2, %v2148_v23  ;;  %v3944_v23 = vld [vmem:[#allocation24_spill] sm:$0xff]  ;;  %v3945_v2 = vmov 0.0  }
 0x226   :  { %732 = vst [vmem:[#allocation3 + $0x8] sm:$0xff] %v730_v4  ;;  %803 = vmatmul.mubr.f32.vlgmr.msra.gmra.mxu0 %v730_v4  ;;  %874 = vmatmul.mubr.f32.vlgmr.msra.gmra.mxu1 %v730_v4  ;;  %v3946_v4 = vld [vmem:[#allocation25_spill] sm:$0xff] }
 0x227   :  { %916 = vmatpush1.msra.mxu0 %v2362_v8  ;;  %987 = vmatpush1.msra.mxu1 %v2367_v9 }
 0x228   :  { %917 = vmatprep.subr.mxu0 %v2374_v10  ;;  %988 = vmatprep.subr.mxu1 %v2379_v11 }
 0x229   :  { %918 = vmatpush1.msra.mxu0 %v2388_v12  ;;  %989 = vmatpush1.msra.mxu1 %v2393_v13 }
 0x22a   :  { %919 = vmatprep.subr.mxu0 %v2405_v15  ;;  %990 = vmatprep.subr.mxu1 %v2410_v16 }
 0x22b   :  { %920 = vmatpush1.msra.mxu0 %v2417_v17  ;;  %991 = vmatpush1.msra.mxu1 %v2422_v18 }
 0x22c   :  { %921 = vmatprep.subr.mxu0 %v2429_v19  ;;  %992 = vmatprep.subr.mxu1 %v2434_v20 }
 0x22d   :  { %922 = vmatpush1.msra.mxu0 %v2443_v21  ;;  %993 = vmatpush1.msra.mxu1 %v2448_v22 }
 0x22e   :  { %923 = vmatprep.subr.mxu0 %v2460_v24  ;;  %994 = vmatprep.subr.mxu1 %v2465_v25 }
 0x22f   :  { %924 = vmatpush1.msra.mxu0 %v2472_v26  ;;  %995 = vmatpush1.msra.mxu1 %v2477_v27 }
 0x230   :  { %925 = vmatprep.subr.mxu0 %v2484_v28  ;;  %996 = vmatprep.subr.mxu1 %v2489_v29 }
 0x231   :  { %926 = vmatpush1.msra.mxu0 %v2498_v30  ;;  %997 = vmatpush1.msra.mxu1 %v2503_v31 }
 0x232   :  { %927 = vmatprep.subr.mxu0 %v2515_v33  ;;  %998 = vmatprep.subr.mxu1 %v2520_v34 }
 0x233   :  { %928 = vmatpush1.msra.mxu0 %v2527_v35  ;;  %999 = vmatpush1.msra.mxu1 %v2532_v36 }
 0x234   :  { %929 = vmatprep.subr.mxu0 %v2539_v37  ;;  %1000 = vmatprep.subr.mxu1 %v2544_v38 }
 0x235   :  { %930 = vmatpush1.msra.mxu0 %v2553_v39  ;;  %1001 = vmatpush1.msra.mxu1 %v2558_v40 }
 0x236   :  { %931 = vmatprep.subr.mxu0 %v2570_v42  ;;  %1002 = vmatprep.subr.mxu1 %v2575_v43 }
 0x237   :  { %932 = vmatpush1.msra.mxu0 %v2582_v44  ;;  %1003 = vmatpush1.msra.mxu1 %v2587_v45 }
 0x238   :  { %933 = vmatprep.subr.mxu0 %v2594_v46  ;;  %1004 = vmatprep.subr.mxu1 %v2599_v47 }
 0x239   :  { %934 = vmatpush1.msra.mxu0 %v2608_v48  ;;  %1005 = vmatpush1.msra.mxu1 %v2613_v49 }
 0x23a   :  { %935 = vmatprep.subr.mxu0 %v2625_v51  ;;  %1006 = vmatprep.subr.mxu1 %v2630_v52 }
 0x23b   :  { %936 = vmatpush1.msra.mxu0 %v2637_v53  ;;  %1007 = vmatpush1.msra.mxu1 %v2642_v54 }
 0x23c   :  { %937 = vmatprep.subr.mxu0 %v2649_v55  ;;  %1008 = vmatprep.subr.mxu1 %v2654_v56 }
 0x23d   :  { %938 = vmatpush1.msra.mxu0 %v3904_v3  ;;  %1009 = vmatpush1.msra.mxu1 %v3929_v0 }
 0x23e   :  { %939 = vmatprep.subr.mxu0 %v3930_v58  ;;  %1010 = vmatprep.subr.mxu1 %v3931_v41  ;;  %v3952_v58 = vld [vmem:[#allocation31_spill] sm:$0xff] }
 0x23f   :  { %940 = vmatpush1.msra.mxu0 %v3932_v5  ;;  %1011 = vmatpush1.msra.mxu1 %v3933_v6  ;;  %v3951_v5 = vld [vmem:[#allocation33_spill] sm:$0xff] }
 0x240   :  { %941 = vmatprep.subr.mxu0 %v3934_v61  ;;  %1012 = vmatprep.subr.mxu1 %v3935_v1 }
 0x241   :  { %942 = vmatpush1.msra.mxu0 %v3936_v63  ;;  %1013 = vmatpush1.msra.mxu1 %v3937_v57  ;;  %v3947_v57 = vld [vmem:[#allocation6_spill] sm:$0xff] }
 0x242   :  { %943 = vmatprep.subr.mxu0 %v3938_v7  ;;  %1014 = vmatprep.subr.mxu1 %v3939_v59  ;;  %v3948_v7 = vld [vmem:[#allocation7_spill] sm:$0xff] }
 0x243   :  { %944 = vmatpush1.msra.mxu0 %v3940_v14  ;;  %1015 = vmatpush1.msra.mxu1 %v3941_v50  ;;  %v3949_v14 = vld [vmem:[#allocation30_spill] sm:$0xff] }
 0x244   :  { %945 = vmatprep.subr.mxu0 %v3942_v62  ;;  %1016 = vmatprep.subr.mxu1 %v3943_v60  ;;  %v3950_v62 = vld [vmem:[#allocation32_spill] sm:$0xff] }
 0x245   :  { %946 = vmatpush1.msra.mxu0 %v3944_v23  ;;  %979 = vmatprep.mubr.f32.mxu0 %v3945_v2 }
 0x246   :  { %1017 = vmatpush1.msra.mxu1 %v3946_v4  ;;  %1050 = vmatprep.mubr.f32.mxu1 %v3945_v2 }
 0x247   :  { %1092 = vmatprep.subr.mxu0 %v3947_v57  ;;  %1163 = vmatprep.subr.mxu1 %v3948_v7 }
 0x2e6   :  { %v804_v59 = vpop.f32.mrf.mxu0  ;;  %v875_v60 = vpop.f32.mrf.mxu1 }
 0x2e7   :  { %v880_v63 = vadd.f32 %v804_v59, %v3949_v14  ;;  %v882_v57 = vadd.f32 %v875_v60, %v3952_v58 }
 0x2e8   :  { %v806_v50 = vpop.f32.mrf.mxu0  ;;  %v877_v6 = vpop.f32.mrf.mxu1 }
 0x2e9   :  { %v2093_v1 = vmul.f32 -1.442695, %v880_v63  ;;  %v881_v61 = vadd.f32 %v806_v50, %v3950_v62  ;;  %v883_v4 = vadd.f32 %v877_v6, %v3951_v5 }
 0x2eb   :  { %2151 = vpow2.f32 %v2093_v1  ;;  %v2094_v23 = vmul.f32 -1.442695, %v881_v61  ;;  %v2095_v41 = vmul.f32 -1.442695, %v883_v4 }
 0x2ed   :  { %2153 = vpow2.f32 %v2094_v23 }
 0x2ee   :  { %2155 = vpow2.f32 %v2095_v41 }
 0x2f8   :  { %v2152_v2 = vpop.eup %2151 }
 0x2f9   :  { %v887_v0 = vadd.f32 1.0, %v2152_v2 }
 0x2fa   :  { %v2154_v7 = vpop.eup %2153 }
 0x2fb   :  { %2157 = vrcp.f32 %v887_v0  ;;  %v893_v59 = vadd.f32 1.0, %v2154_v7  ;;  %v2156_v63 = vpop.eup %2155  ;;  %v3156_v7 = vld [vmem:[%s3769_s2 + $0x1f0] sm:$0xff] }
 0x2fc   :  { %2159 = vtanh.f32 %v882_v57  ;;  %v900_v61 = vadd.f32 1.0, %v2156_v63  ;;  %v3150_v57 = vld [vmem:[%s3769_s2 + $0x1e0] sm:$0xff]  ;;  %v3168_v63 = vld [vmem:[%s3769_s2 + $0x1d8] sm:$0xff] }
 0x2fd   :  { %2161 = vrcp.f32 %v893_v59  ;;  %v3162_v59 = vld [vmem:[%s3769_s2 + $0x1c8] sm:$0xff] }
 0x2fe   :  { %2163 = vrcp.f32 %v900_v61  ;;  %v3192_v61 = vld [vmem:[%s3769_s2 + $0x1b8] sm:$0xff] }
 0x308   :  { %v2158_v14 = vpop.eup %2157 }
 0x309   :  { %v2160_v1 = vpop.eup %2159 }
 0x30a   :  { %v2162_v50 = vpop.eup %2161  ;;  %v904_v62 = vmul.f32 %v2160_v1, %v2158_v14  ;;  %v3174_v14 = vld [vmem:[%s3769_s2 + $0x1c0] sm:$0xff]  ;;  %v3180_v1 = vld [vmem:[%s3769_s2 + $0x1d0] sm:$0xff] }
 0x30b   :  { %v903_v23 = vmul.f32 %v2162_v50, %v2986_v32  ;;  %v2164_v58 = vpop.eup %2163  ;;  %v3186_v50 = vld [vmem:[%s3769_s2 + $0x1a8] sm:$0xff] }
 0x30d   :  { %v3060_v5 = vadd.f32 %v904_v62, %v903_v23  ;;  %v3198_v62 = vld [vmem:[%s3769_s2 + $0x1a0] sm:$0xff]  ;;  %v3204_v23 = vld [vmem:[%s3769_s2 + $0x1b0] sm:$0xff] }
 0x30f   :  { %2165 = vtanh.f32 %v3060_v5 }
 0x31c   :  { %v2166_v6 = vpop.eup %2165 }
 0x31d   :  { %v907_v41 = vmul.f32 %v2166_v6, %v2164_v58  ;;  %v3216_v58 = vld [vmem:[%s3769_s2 + $0x198] sm:$0xff]  ;;  %v3222_v6 = vld [vmem:[%s3769_s2 + $0x180] sm:$0xff] }
 0x31f   :  { %909 = vst [vmem:[#allocation3 + $0x10] sm:$0xff] %v907_v41  ;;  %980 = vmatmul.mubr.f32.vlgmr.msra.gmra.mxu0 %v907_v41  ;;  %1051 = vmatmul.mubr.f32.vlgmr.msra.gmra.mxu1 %v907_v41  ;;  %v3228_v41 = vld [vmem:[%s3769_s2 + $0x190] sm:$0xff] }
 0x320   :  { %1093 = vmatpush1.msra.mxu0 %v2362_v8  ;;  %1164 = vmatpush1.msra.mxu1 %v2367_v9  ;;  %v3953_v8 = vld [vmem:[#allocation9_spill] sm:$0xff]  ;;  %v3954_v9 = vld [vmem:[#allocation10_spill] sm:$0xff] }
 0x321   :  { %1094 = vmatprep.subr.mxu0 %v2374_v10  ;;  %1165 = vmatprep.subr.mxu1 %v2379_v11  ;;  %v3955_v10 = vld [vmem:[#allocation11_spill] sm:$0xff]  ;;  %v3956_v11 = vld [vmem:[#allocation12_spill] sm:$0xff] }
 0x322   :  { %1095 = vmatpush1.msra.mxu0 %v2388_v12  ;;  %1166 = vmatpush1.msra.mxu1 %v2393_v13  ;;  %v3957_v12 = vld [vmem:[#allocation13_spill] sm:$0xff]  ;;  %v3958_v13 = vld [vmem:[#allocation14_spill] sm:$0xff] }
 0x323   :  { %1096 = vmatprep.subr.mxu0 %v2405_v15  ;;  %1167 = vmatprep.subr.mxu1 %v2410_v16  ;;  %v3959_v15 = vld [vmem:[#allocation15_spill] sm:$0xff]  ;;  %v3960_v16 = vld [vmem:[#allocation16_spill] sm:$0xff] }
 0x324   :  { %1097 = vmatpush1.msra.mxu0 %v2417_v17  ;;  %1168 = vmatpush1.msra.mxu1 %v2422_v18  ;;  %v3961_v17 = vld [vmem:[#allocation17_spill] sm:$0xff]  ;;  %v3962_v18 = vld [vmem:[#allocation18_spill] sm:$0xff] }
 0x325   :  { %1098 = vmatprep.subr.mxu0 %v2429_v19  ;;  %1169 = vmatprep.subr.mxu1 %v2434_v20  ;;  %v3963_v19 = vld [vmem:[#allocation19_spill] sm:$0xff]  ;;  %v3964_v20 = vld [vmem:[#allocation20_spill] sm:$0xff] }
 0x326   :  { %1099 = vmatpush1.msra.mxu0 %v2443_v21  ;;  %1170 = vmatpush1.msra.mxu1 %v2448_v22  ;;  %v3965_v21 = vld [vmem:[#allocation21_spill] sm:$0xff]  ;;  %v3966_v22 = vld [vmem:[#allocation22_spill] sm:$0xff] }
 0x327   :  { %1100 = vmatprep.subr.mxu0 %v2460_v24  ;;  %1171 = vmatprep.subr.mxu1 %v2465_v25  ;;  %v3967_v24 = vld [vmem:[#allocation23_spill] sm:$0xff]  ;;  %v3968_v25 = vld [vmem:[#allocation24_spill] sm:$0xff] }
 0x328   :  { %1101 = vmatpush1.msra.mxu0 %v2472_v26  ;;  %1172 = vmatpush1.msra.mxu1 %v2477_v27  ;;  %v3969_v26 = vmov 0.0   ;;  %v3970_v27 = vld [vmem:[#allocation25_spill] sm:$0xff] }
 0x329   :  { %1102 = vmatprep.subr.mxu0 %v2484_v28  ;;  %1173 = vmatprep.subr.mxu1 %v2489_v29  ;;  %v3130_v28 = vld [vmem:[%s3769_s2 + $0x1e8] sm:$0xff]  ;;  %v3136_v29 = vld [vmem:[%s3769_s2 + $0x1f8] sm:$0xff] }
 0x32a   :  { %1103 = vmatpush1.msra.mxu0 %v2498_v30  ;;  %1174 = vmatpush1.msra.mxu1 %v2503_v31  ;;  %3971 = vst [vmem:[#allocation8_spill] sm:$0xff] %v3130_v28  ;;  %3972 = vst [vmem:[#allocation26_spill] sm:$0xff] %v3136_v29  ;;  %v3973_v31 = vld [vmem:[#allocation34_spill] sm:$0xff] }
 0x32b   :  { %1104 = vmatprep.subr.mxu0 %v2515_v33  ;;  %1175 = vmatprep.subr.mxu1 %v2520_v34 }
 0x32c   :  { %1105 = vmatpush1.msra.mxu0 %v2527_v35  ;;  %1176 = vmatpush1.msra.mxu1 %v2532_v36  ;;  %v3974_v36 = vld [vmem:[#allocation36_spill] sm:$0xff] }
 0x32d   :  { %1106 = vmatprep.subr.mxu0 %v2539_v37  ;;  %1177 = vmatprep.subr.mxu1 %v2544_v38 }
 0x32e   :  { %1107 = vmatpush1.msra.mxu0 %v2553_v39  ;;  %1178 = vmatpush1.msra.mxu1 %v2558_v40 }
 0x32f   :  { %1108 = vmatprep.subr.mxu0 %v2570_v42  ;;  %1179 = vmatprep.subr.mxu1 %v2575_v43  ;;  %v3975_v42 = vld [vmem:[#allocation37_spill] sm:$0xff] }
 0x330   :  { %1109 = vmatpush1.msra.mxu0 %v2582_v44  ;;  %1180 = vmatpush1.msra.mxu1 %v2587_v45 }
 0x331   :  { %1110 = vmatprep.subr.mxu0 %v2594_v46  ;;  %1181 = vmatprep.subr.mxu1 %v2599_v47  ;;  %v3976_v46 = vld [vmem:[#allocation35_spill] sm:$0xff] }
 0x332   :  { %1111 = vmatpush1.msra.mxu0 %v2608_v48  ;;  %1182 = vmatpush1.msra.mxu1 %v2613_v49 }
 0x333   :  { %1112 = vmatprep.subr.mxu0 %v2625_v51  ;;  %1183 = vmatprep.subr.mxu1 %v2630_v52 }
 0x334   :  { %1113 = vmatpush1.msra.mxu0 %v2637_v53  ;;  %1184 = vmatpush1.msra.mxu1 %v2642_v54 }
 0x335   :  { %1114 = vmatprep.subr.mxu0 %v2649_v55  ;;  %1185 = vmatprep.subr.mxu1 %v2654_v56 }
 0x336   :  { %1115 = vmatpush1.msra.mxu0 %v3904_v3  ;;  %1186 = vmatpush1.msra.mxu1 %v3953_v8  ;;  %v3234_v8 = vld [vmem:[%s3769_s2 + $0x168] sm:$0xff] }
 0x337   :  { %1116 = vmatprep.subr.mxu0 %v3954_v9  ;;  %1187 = vmatprep.subr.mxu1 %v3955_v10  ;;  %v3240_v9 = vld [vmem:[%s3769_s2 + $0x178] sm:$0xff]  ;;  %v3246_v10 = vld [vmem:[%s3769_s2 + $0x160] sm:$0xff] }
 0x338   :  { %1117 = vmatpush1.msra.mxu0 %v3956_v11  ;;  %1188 = vmatpush1.msra.mxu1 %v3957_v12  ;;  %v3252_v11 = vld [vmem:[%s3769_s2 + $0x170] sm:$0xff]  ;;  %v3258_v12 = vld [vmem:[%s3769_s2 + $0x148] sm:$0xff] }
 0x339   :  { %1118 = vmatprep.subr.mxu0 %v3958_v13  ;;  %1189 = vmatprep.subr.mxu1 %v3959_v15  ;;  %v3264_v13 = vld [vmem:[%s3769_s2 + $0x158] sm:$0xff]  ;;  %v3270_v15 = vld [vmem:[%s3769_s2 + $0x140] sm:$0xff] }
 0x33a   :  { %1119 = vmatpush1.msra.mxu0 %v3960_v16  ;;  %1190 = vmatpush1.msra.mxu1 %v3961_v17  ;;  %v3276_v16 = vld [vmem:[%s3769_s2 + $0x150] sm:$0xff]  ;;  %v3282_v17 = vld [vmem:[%s3769_s2 + $0x128] sm:$0xff] }
 0x33b   :  { %1120 = vmatprep.subr.mxu0 %v3962_v18  ;;  %1191 = vmatprep.subr.mxu1 %v3963_v19  ;;  %v3288_v18 = vld [vmem:[%s3769_s2 + $0x138] sm:$0xff]  ;;  %v3294_v19 = vld [vmem:[%s3769_s2 + $0x120] sm:$0xff] }
 0x33c   :  { %1121 = vmatpush1.msra.mxu0 %v3964_v20  ;;  %1192 = vmatpush1.msra.mxu1 %v3965_v21  ;;  %v3300_v20 = vld [vmem:[%s3769_s2 + $0x130] sm:$0xff]  ;;  %v3306_v21 = vld [vmem:[%s3769_s2 + $0x108] sm:$0xff] }
 0x33d   :  { %1122 = vmatprep.subr.mxu0 %v3966_v22  ;;  %1193 = vmatprep.subr.mxu1 %v3967_v24  ;;  %v3312_v22 = vld [vmem:[%s3769_s2 + $0x118] sm:$0xff]  ;;  %v3318_v24 = vld [vmem:[%s3769_s2 + $0x100] sm:$0xff] }
 0x33e   :  { %1123 = vmatpush1.msra.mxu0 %v3968_v25  ;;  %1156 = vmatprep.mubr.f32.mxu0 %v3969_v26  ;;  %v3324_v25 = vld [vmem:[%s3769_s2 + $0x110] sm:$0xff] }
 0x33f   :  { %1194 = vmatpush1.msra.mxu1 %v3970_v27  ;;  %1227 = vmatprep.mubr.f32.mxu1 %v3969_v26  ;;  %v3330_v27 = vld [vmem:[%s3769_s2 + $0xe8] sm:$0xff] }
 0x340   :  { %1269 = vmatprep.subr.mxu0 %v3130_v28  ;;  %1340 = vmatprep.subr.mxu1 %v3136_v29 }
 0x3df   :  { %v981_v30 = vpop.f32.mrf.mxu0  ;;  %v1052_v38 = vpop.f32.mrf.mxu1 }
 0x3e0   :  { %v1057_v33 = vadd.f32 %v981_v30, %v3973_v31  ;;  %v1059_v47 = vadd.f32 %v1052_v38, %v3976_v46  ;;  %v3336_v30 = vld [vmem:[%s3769_s2 + $0xf8] sm:$0xff]  ;;  %v3342_v31 = vld [vmem:[%s3769_s2 + $0xe0] sm:$0xff]  ;;  %v3378_v38 = vld [vmem:[%s3769_s2 + $0xa8] sm:$0xff] }
 0x3e1   :  { %v983_v34 = vpop.f32.mrf.mxu0  ;;  %v1054_v40 = vpop.f32.mrf.mxu1  ;;  %v3420_v46 = vld [vmem:[%s3769_s2 + $0x90] sm:$0xff] }
 0x3e2   :  { %v2096_v35 = vmul.f32 -1.442695, %v1057_v33  ;;  %v1058_v37 = vadd.f32 %v983_v34, %v3974_v36  ;;  %v1060_v43 = vadd.f32 %v1054_v40, %v3975_v42  ;;  %v3348_v33 = vld [vmem:[%s3769_s2 + $0xf0] sm:$0xff]  ;;  %v3354_v34 = vld [vmem:[%s3769_s2 + $0xc8] sm:$0xff]  ;;  %v3366_v36 = vld [vmem:[%s3769_s2 + $0xc0] sm:$0xff]  ;;  %3977 = vst [vmem:[#allocation28_spill] sm:$0xff] %v3420_v46 }
 0x3e3   :  { %v3390_v40 = vld [vmem:[%s3769_s2 + $0xa0] sm:$0xff]  ;;  %v3396_v42 = vld [vmem:[%s3769_s2 + $0xb0] sm:$0xff] }
 0x3e4   :  { %2167 = vpow2.f32 %v2096_v35  ;;  %v2097_v39 = vmul.f32 -1.442695, %v1058_v37  ;;  %v2098_v44 = vmul.f32 -1.442695, %v1060_v43  ;;  %v3360_v35 = vld [vmem:[%s3769_s2 + $0xd8] sm:$0xff]  ;;  %v3372_v37 = vld [vmem:[%s3769_s2 + $0xd0] sm:$0xff] }
 0x3e5   :  { %v3402_v43 = vld [vmem:[%s3769_s2 + $0x88] sm:$0xff] }
 0x3e6   :  { %2169 = vpow2.f32 %v2097_v39  ;;  %v3384_v39 = vld [vmem:[%s3769_s2 + $0xb8] sm:$0xff] }
 0x3e7   :  { %2171 = vpow2.f32 %v2098_v44  ;;  %v3408_v44 = vld [vmem:[%s3769_s2 + $0x98] sm:$0xff] }
 0x3f1   :  { %v2168_v45 = vpop.eup %2167 }
 0x3f2   :  { %v1064_v48 = vadd.f32 1.0, %v2168_v45  ;;  %v3414_v45 = vld [vmem:[%s3769_s2 + $0x80] sm:$0xff] }
 0x3f3   :  { %v2170_v49 = vpop.eup %2169 }
 0x3f4   :  { %2173 = vrcp.f32 %v1064_v48  ;;  %v1070_v51 = vadd.f32 1.0, %v2170_v49  ;;  %v2172_v52 = vpop.eup %2171  ;;  %v3432_v48 = vld [vmem:[%s3769_s2 + $0x78] sm:$0xff]  ;;  %v3438_v49 = vld [vmem:[%s3769_s2 + $0x60] sm:$0xff] }
 0x3f5   :  { %2175 = vtanh.f32 %v1059_v47  ;;  %v1077_v56 = vadd.f32 1.0, %v2172_v52  ;;  %v3426_v47 = vld [vmem:[%s3769_s2 + $0x68] sm:$0xff]  ;;  %3979 = vst [vmem:[#allocation27_spill] sm:$0xff] %v3432_v48  ;;  %3980 = vst [vmem:[#allocation6_spill] sm:$0xff] %v3438_v49 }
 0x3f6   :  { %2177 = vrcp.f32 %v1070_v51  ;;  %3978 = vst [vmem:[#allocation29_spill] sm:$0xff] %v3426_v47  ;;  %v3444_v51 = vld [vmem:[%s3769_s2 + $0x70] sm:$0xff]  ;;  %v3450_v52 = vld [vmem:[%s3769_s2 + $0x48] sm:$0xff] }
 0x3f7   :  { %2179 = vrcp.f32 %v1077_v56  ;;  %3981 = vst [vmem:[#allocation7_spill] sm:$0xff] %v3444_v51  ;;  %3982 = vst [vmem:[#allocation30_spill] sm:$0xff] %v3450_v52  ;;  %v3474_v56 = vld [vmem:[%s3769_s2 + $0x28] sm:$0xff] }
 0x3f8   :  { %3986 = vst [vmem:[#allocation9_spill] sm:$0xff] %v3474_v56 }
 0x401   :  { %v2174_v53 = vpop.eup %2173 }
 0x402   :  { %v2176_v54 = vpop.eup %2175 }
 0x403   :  { %v2178_v55 = vpop.eup %2177  ;;  %v1081_v3 = vmul.f32 %v2176_v54, %v2174_v53  ;;  %v3456_v53 = vld [vmem:[%s3769_s2 + $0x58] sm:$0xff]  ;;  %v3462_v54 = vld [vmem:[%s3769_s2 + $0x40] sm:$0xff] }
 0x404   :  { %v1080_v32 = vmul.f32 %v2178_v55, %v3060_v5  ;;  %v2180_v60 = vpop.eup %2179  ;;  %v3210_v5 = vld [vmem:[%s3769_s2 + $0x188] sm:$0xff]  ;;  %3983 = vst [vmem:[#allocation32_spill] sm:$0xff] %v3456_v53  ;;  %3984 = vst [vmem:[#allocation33_spill] sm:$0xff] %v3462_v54  ;;  %v3468_v55 = vld [vmem:[%s3769_s2 + $0x50] sm:$0xff] }
 0x405   :  { %3985 = vst [vmem:[#allocation31_spill] sm:$0xff] %v3468_v55 }
 0x406   :  { %v3144_v0 = vadd.f32 %v1081_v3, %v1080_v32  ;;  %v3480_v3 = vld [vmem:[%s3769_s2 + $0x38] sm:$0xff]  ;;  %v3486_v32 = vld [vmem:[%s3769_s2 + $0x20] sm:$0xff] }
 0x407   :  { %3987 = vst [vmem:[#allocation10_spill] sm:$0xff] %v3480_v3  ;;  %3988 = vst [vmem:[#allocation11_spill] sm:$0xff] %v3486_v32 }
 0x408   :  { %2181 = vtanh.f32 %v3144_v0 }
 0x415   :  { %v2182_v2 = vpop.eup %2181 }
 0x416   :  { %v1084_v4 = vmul.f32 %v2182_v2, %v2180_v60  ;;  %v3492_v60 = vld [vmem:[%s3769_s2 + $0x30] sm:$0xff]  ;;  %v3498_v2 = vld [vmem:[%s3769_s2 + $0x8] sm:$0xff] }
 0x417   :  { %3989 = vst [vmem:[#allocation12_spill] sm:$0xff] %v3492_v60  ;;  %3990 = vst [vmem:[#allocation13_spill] sm:$0xff] %v3498_v2 }
 0x418   :  { %1086 = vst [vmem:[#allocation3 + $0x18] sm:$0xff] %v1084_v4  ;;  %1157 = vmatmul.mubr.f32.vlgmr.msra.gmra.mxu0 %v1084_v4  ;;  %1228 = vmatmul.mubr.f32.vlgmr.msra.gmra.mxu1 %v1084_v4  ;;  %v3504_v4 = vld [vmem:[%s3769_s2 + $0x18] sm:$0xff] }
 0x419   :  { %1270 = vmatpush1.msra.mxu0 %v3150_v57  ;;  %1341 = vmatpush1.msra.mxu1 %v3156_v7  ;;  %3991 = vst [vmem:[#allocation14_spill] sm:$0xff] %v3504_v4 }
 0x41a   :  { %1271 = vmatprep.subr.mxu0 %v3162_v59  ;;  %1342 = vmatprep.subr.mxu1 %v3168_v63 }
 0x41b   :  { %1272 = vmatpush1.msra.mxu0 %v3174_v14  ;;  %1343 = vmatpush1.msra.mxu1 %v3180_v1 }
 0x41c   :  { %1273 = vmatprep.subr.mxu0 %v3186_v50  ;;  %1344 = vmatprep.subr.mxu1 %v3192_v61 }
 0x41d   :  { %1274 = vmatpush1.msra.mxu0 %v3198_v62  ;;  %1345 = vmatpush1.msra.mxu1 %v3204_v23 }
 0x41e   :  { %1275 = vmatprep.subr.mxu0 %v3210_v5  ;;  %1346 = vmatprep.subr.mxu1 %v3216_v58 }
 0x41f   :  { %1276 = vmatpush1.msra.mxu0 %v3222_v6  ;;  %1347 = vmatpush1.msra.mxu1 %v3228_v41 }
 0x420   :  { %1277 = vmatprep.subr.mxu0 %v3234_v8  ;;  %1348 = vmatprep.subr.mxu1 %v3240_v9 }
 0x421   :  { %1278 = vmatpush1.msra.mxu0 %v3246_v10  ;;  %1349 = vmatpush1.msra.mxu1 %v3252_v11 }
 0x422   :  { %1279 = vmatprep.subr.mxu0 %v3258_v12  ;;  %1350 = vmatprep.subr.mxu1 %v3264_v13 }
 0x423   :  { %1280 = vmatpush1.msra.mxu0 %v3270_v15  ;;  %1351 = vmatpush1.msra.mxu1 %v3276_v16 }
 0x424   :  { %1281 = vmatprep.subr.mxu0 %v3282_v17  ;;  %1352 = vmatprep.subr.mxu1 %v3288_v18 }
 0x425   :  { %1282 = vmatpush1.msra.mxu0 %v3294_v19  ;;  %1353 = vmatpush1.msra.mxu1 %v3300_v20 }
 0x426   :  { %1283 = vmatprep.subr.mxu0 %v3306_v21  ;;  %1354 = vmatprep.subr.mxu1 %v3312_v22 }
 0x427   :  { %1284 = vmatpush1.msra.mxu0 %v3318_v24  ;;  %1355 = vmatpush1.msra.mxu1 %v3324_v25 }
 0x428   :  { %1285 = vmatprep.subr.mxu0 %v3330_v27  ;;  %1356 = vmatprep.subr.mxu1 %v3336_v30 }
 0x429   :  { %1286 = vmatpush1.msra.mxu0 %v3342_v31  ;;  %1357 = vmatpush1.msra.mxu1 %v3348_v33 }
 0x42a   :  { %1287 = vmatprep.subr.mxu0 %v3354_v34  ;;  %1358 = vmatprep.subr.mxu1 %v3360_v35 }
 0x42b   :  { %1288 = vmatpush1.msra.mxu0 %v3366_v36  ;;  %1359 = vmatpush1.msra.mxu1 %v3372_v37 }
 0x42c   :  { %1289 = vmatprep.subr.mxu0 %v3378_v38  ;;  %1360 = vmatprep.subr.mxu1 %v3384_v39 }
 0x42d   :  { %1290 = vmatpush1.msra.mxu0 %v3390_v40  ;;  %1361 = vmatpush1.msra.mxu1 %v3396_v42 }
 0x42e   :  { %1291 = vmatprep.subr.mxu0 %v3402_v43  ;;  %1362 = vmatprep.subr.mxu1 %v3408_v44 }
 0x42f   :  { %1292 = vmatpush1.msra.mxu0 %v3414_v45  ;;  %1363 = vmatpush1.msra.mxu1 %v3420_v46 }
 0x430   :  { %1293 = vmatprep.subr.mxu0 %v3426_v47  ;;  %1364 = vmatprep.subr.mxu1 %v3432_v48  ;;  %v3997_v47 = vld [vmem:[#allocation39_spill] sm:$0xff] }
 0x431   :  { %1294 = vmatpush1.msra.mxu0 %v3438_v49  ;;  %1365 = vmatpush1.msra.mxu1 %v3444_v51  ;;  %v3996_v49 = vld [vmem:[#allocation41_spill] sm:$0xff] }
 0x432   :  { %1295 = vmatprep.subr.mxu0 %v3450_v52  ;;  %1366 = vmatprep.subr.mxu1 %v3456_v53 }
 0x433   :  { %1296 = vmatpush1.msra.mxu0 %v3462_v54  ;;  %1367 = vmatpush1.msra.mxu1 %v3468_v55  ;;  %v3995_v55 = vld [vmem:[#allocation40_spill] sm:$0xff] }
 0x434   :  { %1297 = vmatprep.subr.mxu0 %v3474_v56  ;;  %1368 = vmatprep.subr.mxu1 %v3480_v3 }
 0x435   :  { %1298 = vmatpush1.msra.mxu0 %v3486_v32  ;;  %1369 = vmatpush1.msra.mxu1 %v3492_v60  ;;  %v3510_v32 = vld [vmem:[%s3769_s2] sm:$0xff] }
 0x436   :  { %1299 = vmatprep.subr.mxu0 %v3498_v2  ;;  %1370 = vmatprep.subr.mxu1 %v3504_v4  ;;  %3992 = vst [vmem:[#allocation15_spill] sm:$0xff] %v3510_v32  ;;  %v3517_v2 = vld [vmem:[%s3769_s2 + $0x10] sm:$0xff]  ;;  %v3994_v60 = vld [vmem:[#allocation38_spill] sm:$0xff] }
 0x437   :  { %1300 = vmatpush1.msra.mxu0 %v3510_v32  ;;  %1333 = vmatprep.mubr.f32.mxu0 %v3969_v26  ;;  %3993 = vst [vmem:[#allocation16_spill] sm:$0xff] %v3517_v2 }
 0x438   :  { %1371 = vmatpush1.msra.mxu1 %v3517_v2  ;;  %1404 = vmatprep.mubr.f32.mxu1 %v3969_v26 }
 0x439   :  { %1446 = vmatprep.subr.mxu0 %v3130_v28  ;;  %1517 = vmatprep.subr.mxu1 %v3136_v29 }
 0x4d8   :  { %v1158_v4 = vpop.f32.mrf.mxu0  ;;  %v1229_v53 = vpop.f32.mrf.mxu1 }
 0x4d9   :  { %v1234_v3 = vadd.f32 %v1158_v4, %v3994_v60  ;;  %v1236_v28 = vadd.f32 %v1229_v53, %v3997_v47  ;;  %v4003_v53 = vld [vmem:[#allocation30_spill] sm:$0xff] }
 0x4da   :  { %v1160_v56 = vpop.f32.mrf.mxu0  ;;  %v1231_v51 = vpop.f32.mrf.mxu1 }
 0x4db   :  { %v2099_v32 = vmul.f32 -1.442695, %v1234_v3  ;;  %v1235_v54 = vadd.f32 %v1160_v56, %v3995_v55  ;;  %v1237_v2 = vadd.f32 %v1231_v51, %v3996_v49  ;;  %v4002_v51 = vld [vmem:[#allocation7_spill] sm:$0xff] }
 0x4dd   :  { %2183 = vpow2.f32 %v2099_v32  ;;  %v2100_v52 = vmul.f32 -1.442695, %v1235_v54  ;;  %v2101_v48 = vmul.f32 -1.442695, %v1237_v2  ;;  %v4004_v2 = vld [vmem:[#allocation32_spill] sm:$0xff] }
 0x4df   :  { %2185 = vpow2.f32 %v2100_v52 }
 0x4e0   :  { %2187 = vpow2.f32 %v2101_v48 }
 0x4ea   :  { %v2184_v26 = vpop.eup %2183 }
 0x4eb   :  { %v1241_v46 = vadd.f32 1.0, %v2184_v26 }
 0x4ec   :  { %v2186_v29 = vpop.eup %2185 }
 0x4ed   :  { %2189 = vrcp.f32 %v1241_v46  ;;  %v1247_v60 = vadd.f32 1.0, %v2186_v29  ;;  %v2188_v3 = vpop.eup %2187  ;;  %v3999_v29 = vld [vmem:[#allocation29_spill] sm:$0xff]  ;;  %v4001_v46 = vld [vmem:[#allocation6_spill] sm:$0xff] }
 0x4ee   :  { %2191 = vtanh.f32 %v1236_v28  ;;  %v1254_v54 = vadd.f32 1.0, %v2188_v3  ;;  %v3998_v28 = vld [vmem:[#allocation28_spill] sm:$0xff]  ;;  %v4006_v3 = vld [vmem:[#allocation31_spill] sm:$0xff] }
 0x4ef   :  { %2193 = vrcp.f32 %v1247_v60  ;;  %v4005_v60 = vld [vmem:[#allocation33_spill] sm:$0xff] }
 0x4f0   :  { %2195 = vrcp.f32 %v1254_v54  ;;  %v4010_v54 = vld [vmem:[#allocation12_spill] sm:$0xff] }
 0x4fa   :  { %v2190_v55 = vpop.eup %2189 }
 0x4fb   :  { %v2192_v56 = vpop.eup %2191 }
 0x4fc   :  { %v2194_v32 = vpop.eup %2193  ;;  %v1258_v52 = vmul.f32 %v2192_v56, %v2190_v55  ;;  %v4007_v55 = vld [vmem:[#allocation9_spill] sm:$0xff]  ;;  %v4008_v56 = vld [vmem:[#allocation10_spill] sm:$0xff] }
 0x4fd   :  { %v1257_v4 = vmul.f32 %v2194_v32, %v3144_v0  ;;  %v2196_v26 = vpop.eup %2195  ;;  %v4000_v0 = vld [vmem:[#allocation27_spill] sm:$0xff] }
 0x4fe   :  { %v4009_v32 = vld [vmem:[#allocation11_spill] sm:$0xff] }
 0x4ff   :  { %v3528_v49 = vadd.f32 %v1258_v52, %v1257_v4  ;;  %v4011_v52 = vld [vmem:[#allocation13_spill] sm:$0xff]  ;;  %v4012_v4 = vld [vmem:[#allocation14_spill] sm:$0xff] }
 0x501   :  { %2197 = vtanh.f32 %v3528_v49 }
 0x50e   :  { %v2198_v47 = vpop.eup %2197 }
 0x50f   :  { %v1261_v48 = vmul.f32 %v2198_v47, %v2196_v26  ;;  %v4013_v26 = vld [vmem:[#allocation15_spill] sm:$0xff]  ;;  %v4014_v47 = vmov 0.0  }
 0x511   :  { %1263 = vst [vmem:[#allocation3 + $0x20] sm:$0xff] %v1261_v48  ;;  %1334 = vmatmul.mubr.f32.vlgmr.msra.gmra.mxu0 %v1261_v48  ;;  %1405 = vmatmul.mubr.f32.vlgmr.msra.gmra.mxu1 %v1261_v48  ;;  %v4015_v48 = vld [vmem:[#allocation16_spill] sm:$0xff] }
 0x512   :  { %1447 = vmatpush1.msra.mxu0 %v3150_v57  ;;  %1518 = vmatpush1.msra.mxu1 %v3156_v7 }
 0x513   :  { %1448 = vmatprep.subr.mxu0 %v3162_v59  ;;  %1519 = vmatprep.subr.mxu1 %v3168_v63 }
 0x514   :  { %1449 = vmatpush1.msra.mxu0 %v3174_v14  ;;  %1520 = vmatpush1.msra.mxu1 %v3180_v1 }
 0x515   :  { %1450 = vmatprep.subr.mxu0 %v3186_v50  ;;  %1521 = vmatprep.subr.mxu1 %v3192_v61 }
 0x516   :  { %1451 = vmatpush1.msra.mxu0 %v3198_v62  ;;  %1522 = vmatpush1.msra.mxu1 %v3204_v23 }
 0x517   :  { %1452 = vmatprep.subr.mxu0 %v3210_v5  ;;  %1523 = vmatprep.subr.mxu1 %v3216_v58 }
 0x518   :  { %1453 = vmatpush1.msra.mxu0 %v3222_v6  ;;  %1524 = vmatpush1.msra.mxu1 %v3228_v41 }
 0x519   :  { %1454 = vmatprep.subr.mxu0 %v3234_v8  ;;  %1525 = vmatprep.subr.mxu1 %v3240_v9 }
 0x51a   :  { %1455 = vmatpush1.msra.mxu0 %v3246_v10  ;;  %1526 = vmatpush1.msra.mxu1 %v3252_v11 }
 0x51b   :  { %1456 = vmatprep.subr.mxu0 %v3258_v12  ;;  %1527 = vmatprep.subr.mxu1 %v3264_v13 }
 0x51c   :  { %1457 = vmatpush1.msra.mxu0 %v3270_v15  ;;  %1528 = vmatpush1.msra.mxu1 %v3276_v16 }
 0x51d   :  { %1458 = vmatprep.subr.mxu0 %v3282_v17  ;;  %1529 = vmatprep.subr.mxu1 %v3288_v18 }
 0x51e   :  { %1459 = vmatpush1.msra.mxu0 %v3294_v19  ;;  %1530 = vmatpush1.msra.mxu1 %v3300_v20 }
 0x51f   :  { %1460 = vmatprep.subr.mxu0 %v3306_v21  ;;  %1531 = vmatprep.subr.mxu1 %v3312_v22 }
 0x520   :  { %1461 = vmatpush1.msra.mxu0 %v3318_v24  ;;  %1532 = vmatpush1.msra.mxu1 %v3324_v25 }
 0x521   :  { %1462 = vmatprep.subr.mxu0 %v3330_v27  ;;  %1533 = vmatprep.subr.mxu1 %v3336_v30 }
 0x522   :  { %1463 = vmatpush1.msra.mxu0 %v3342_v31  ;;  %1534 = vmatpush1.msra.mxu1 %v3348_v33 }
 0x523   :  { %1464 = vmatprep.subr.mxu0 %v3354_v34  ;;  %1535 = vmatprep.subr.mxu1 %v3360_v35 }
 0x524   :  { %1465 = vmatpush1.msra.mxu0 %v3366_v36  ;;  %1536 = vmatpush1.msra.mxu1 %v3372_v37 }
 0x525   :  { %1466 = vmatprep.subr.mxu0 %v3378_v38  ;;  %1537 = vmatprep.subr.mxu1 %v3384_v39 }
 0x526   :  { %1467 = vmatpush1.msra.mxu0 %v3390_v40  ;;  %1538 = vmatpush1.msra.mxu1 %v3396_v42 }
 0x527   :  { %1468 = vmatprep.subr.mxu0 %v3402_v43  ;;  %1539 = vmatprep.subr.mxu1 %v3408_v44 }
 0x528   :  { %1469 = vmatpush1.msra.mxu0 %v3414_v45  ;;  %1540 = vmatpush1.msra.mxu1 %v3998_v28 }
 0x529   :  { %1470 = vmatprep.subr.mxu0 %v3999_v29  ;;  %1541 = vmatprep.subr.mxu1 %v4000_v0  ;;  %v4021_v29 = vld [vmem:[#allocation43_spill] sm:$0xff] }
 0x52a   :  { %1471 = vmatpush1.msra.mxu0 %v4001_v46  ;;  %1542 = vmatpush1.msra.mxu1 %v4002_v51  ;;  %v4020_v46 = vld [vmem:[#allocation45_spill] sm:$0xff] }
 0x52b   :  { %1472 = vmatprep.subr.mxu0 %v4003_v53  ;;  %1543 = vmatprep.subr.mxu1 %v4004_v2 }
 0x52c   :  { %1473 = vmatpush1.msra.mxu0 %v4005_v60  ;;  %1544 = vmatpush1.msra.mxu1 %v4006_v3  ;;  %v4016_v3 = vld [vmem:[#allocation8_spill] sm:$0xff] }
 0x52d   :  { %1474 = vmatprep.subr.mxu0 %v4007_v55  ;;  %1545 = vmatprep.subr.mxu1 %v4008_v56  ;;  %v4017_v55 = vld [vmem:[#allocation26_spill] sm:$0xff] }
 0x52e   :  { %1475 = vmatpush1.msra.mxu0 %v4009_v32  ;;  %1546 = vmatpush1.msra.mxu1 %v4010_v54  ;;  %v4018_v32 = vld [vmem:[#allocation42_spill] sm:$0xff] }
 0x52f   :  { %1476 = vmatprep.subr.mxu0 %v4011_v52  ;;  %1547 = vmatprep.subr.mxu1 %v4012_v4  ;;  %v4019_v52 = vld [vmem:[#allocation44_spill] sm:$0xff] }
 0x530   :  { %1477 = vmatpush1.msra.mxu0 %v4013_v26  ;;  %1510 = vmatprep.mubr.f32.mxu0 %v4014_v47 }
 0x531   :  { %1548 = vmatpush1.msra.mxu1 %v4015_v48  ;;  %1581 = vmatprep.mubr.f32.mxu1 %v4014_v47 }
 0x532   :  { %1623 = vmatprep.subr.mxu0 %v4016_v3  ;;  %1694 = vmatprep.subr.mxu1 %v4017_v55 }
 0x5d1   :  { %v1335_v56 = vpop.f32.mrf.mxu0  ;;  %v1406_v4 = vpop.f32.mrf.mxu1 }
 0x5d2   :  { %v1411_v60 = vadd.f32 %v1335_v56, %v4018_v32  ;;  %v1413_v3 = vadd.f32 %v1406_v4, %v4021_v29 }
 0x5d3   :  { %v1337_v54 = vpop.f32.mrf.mxu0  ;;  %v1408_v51 = vpop.f32.mrf.mxu1 }
 0x5d4   :  { %v2102_v2 = vmul.f32 -1.442695, %v1411_v60  ;;  %v1412_v53 = vadd.f32 %v1337_v54, %v4019_v52  ;;  %v1414_v48 = vadd.f32 %v1408_v51, %v4020_v46 }
 0x5d6   :  { %2199 = vpow2.f32 %v2102_v2  ;;  %v2103_v26 = vmul.f32 -1.442695, %v1412_v53  ;;  %v2104_v0 = vmul.f32 -1.442695, %v1414_v48  ;;  %v4044_v48 = vld [vmem:[#allocation50_spill] sm:$0xff] }
 0x5d8   :  { %2201 = vpow2.f32 %v2103_v26 }
 0x5d9   :  { %2203 = vpow2.f32 %v2104_v0 }
 0x5e3   :  { %v2200_v47 = vpop.eup %2199 }
 0x5e4   :  { %v1418_v28 = vadd.f32 1.0, %v2200_v47 }
 0x5e5   :  { %v2202_v55 = vpop.eup %2201 }
 0x5e6   :  { %2205 = vrcp.f32 %v1418_v28  ;;  %v1424_v56 = vadd.f32 1.0, %v2202_v55  ;;  %v2204_v60 = vpop.eup %2203 }
 0x5e7   :  { %2207 = vtanh.f32 %v1413_v3  ;;  %v1431_v53 = vadd.f32 1.0, %v2204_v60  ;;  %v4045_v60 = vld [vmem:[#allocation51_spill] sm:$0xff] }
 0x5e8   :  { %2209 = vrcp.f32 %v1424_v56 }
 0x5e9   :  { %2211 = vrcp.f32 %v1431_v53 }
 0x5f3   :  { %v2206_v32 = vpop.eup %2205 }
 0x5f4   :  { %v2208_v2 = vpop.eup %2207 }
 0x5f5   :  { %v2210_v54 = vpop.eup %2209  ;;  %v1435_v52 = vmul.f32 %v2208_v2, %v2206_v32 }
 0x5f6   :  { %v1434_v26 = vmul.f32 %v2210_v54, %v3528_v49  ;;  %v2212_v29 = vpop.eup %2211 }
 0x5f8   :  { %v3602_v46 = vadd.f32 %v1435_v52, %v1434_v26  ;;  %v4046_v52 = vld [vmem:[#allocation53_spill] sm:$0xff] }
 0x5fa   :  { %2213 = vtanh.f32 %v3602_v46 }
 0x607   :  { %v2214_v51 = vpop.eup %2213 }
 0x608   :  { %v1438_v0 = vmul.f32 %v2214_v51, %v2212_v29  ;;  %v4047_v51 = vld [vmem:[#allocation52_spill] sm:$0xff] }
 0x60a   :  { %1440 = vst [vmem:[#allocation3 + $0x28] sm:$0xff] %v1438_v0  ;;  %1511 = vmatmul.mubr.f32.vlgmr.msra.gmra.mxu0 %v1438_v0  ;;  %1582 = vmatmul.mubr.f32.vlgmr.msra.gmra.mxu1 %v1438_v0 }
 0x60b   :  { %1624 = vmatpush1.msra.mxu0 %v3150_v57  ;;  %1695 = vmatpush1.msra.mxu1 %v3156_v7  ;;  %v4022_v57 = vld [vmem:[#allocation28_spill] sm:$0xff]  ;;  %v4023_v7 = vld [vmem:[#allocation29_spill] sm:$0xff] }
 0x60c   :  { %1625 = vmatprep.subr.mxu0 %v3162_v59  ;;  %1696 = vmatprep.subr.mxu1 %v3168_v63  ;;  %v4024_v59 = vld [vmem:[#allocation27_spill] sm:$0xff]  ;;  %v4025_v63 = vld [vmem:[#allocation6_spill] sm:$0xff] }
 0x60d   :  { %1626 = vmatpush1.msra.mxu0 %v3174_v14  ;;  %1697 = vmatpush1.msra.mxu1 %v3180_v1  ;;  %v4026_v14 = vld [vmem:[#allocation7_spill] sm:$0xff]  ;;  %v4027_v1 = vld [vmem:[#allocation30_spill] sm:$0xff] }
 0x60e   :  { %1627 = vmatprep.subr.mxu0 %v3186_v50  ;;  %1698 = vmatprep.subr.mxu1 %v3192_v61  ;;  %v4028_v50 = vld [vmem:[#allocation32_spill] sm:$0xff]  ;;  %v4029_v61 = vld [vmem:[#allocation33_spill] sm:$0xff] }
 0x60f   :  { %1628 = vmatpush1.msra.mxu0 %v3198_v62  ;;  %1699 = vmatpush1.msra.mxu1 %v3204_v23  ;;  %v4030_v62 = vld [vmem:[#allocation31_spill] sm:$0xff]  ;;  %v4031_v23 = vld [vmem:[#allocation9_spill] sm:$0xff] }
 0x610   :  { %1629 = vmatprep.subr.mxu0 %v3210_v5  ;;  %1700 = vmatprep.subr.mxu1 %v3216_v58  ;;  %v4032_v5 = vld [vmem:[#allocation10_spill] sm:$0xff]  ;;  %v4033_v58 = vld [vmem:[#allocation11_spill] sm:$0xff] }
 0x611   :  { %1630 = vmatpush1.msra.mxu0 %v3222_v6  ;;  %1701 = vmatpush1.msra.mxu1 %v3228_v41  ;;  %v4034_v6 = vld [vmem:[#allocation12_spill] sm:$0xff]  ;;  %v4035_v41 = vld [vmem:[#allocation13_spill] sm:$0xff] }
 0x612   :  { %1631 = vmatprep.subr.mxu0 %v3234_v8  ;;  %1702 = vmatprep.subr.mxu1 %v3240_v9  ;;  %v4036_v8 = vld [vmem:[#allocation14_spill] sm:$0xff]  ;;  %v4037_v9 = vld [vmem:[#allocation15_spill] sm:$0xff] }
 0x613   :  { %1632 = vmatpush1.msra.mxu0 %v3246_v10  ;;  %1703 = vmatpush1.msra.mxu1 %v3252_v11  ;;  %v4038_v10 = vmov 0.0   ;;  %v4039_v11 = vld [vmem:[#allocation16_spill] sm:$0xff] }
 0x614   :  { %1633 = vmatprep.subr.mxu0 %v3258_v12  ;;  %1704 = vmatprep.subr.mxu1 %v3264_v13  ;;  %v4040_v13 = vld [vmem:[#allocation46_spill] sm:$0xff] }
 0x615   :  { %1634 = vmatpush1.msra.mxu0 %v3270_v15  ;;  %1705 = vmatpush1.msra.mxu1 %v3276_v16 }
 0x616   :  { %1635 = vmatprep.subr.mxu0 %v3282_v17  ;;  %1706 = vmatprep.subr.mxu1 %v3288_v18  ;;  %v4041_v18 = vld [vmem:[#allocation48_spill] sm:$0xff] }
 0x617   :  { %1636 = vmatpush1.msra.mxu0 %v3294_v19  ;;  %1707 = vmatpush1.msra.mxu1 %v3300_v20 }
 0x618   :  { %1637 = vmatprep.subr.mxu0 %v3306_v21  ;;  %1708 = vmatprep.subr.mxu1 %v3312_v22 }
 0x619   :  { %1638 = vmatpush1.msra.mxu0 %v3318_v24  ;;  %1709 = vmatpush1.msra.mxu1 %v3324_v25  ;;  %v4042_v24 = vld [vmem:[#allocation49_spill] sm:$0xff] }
 0x61a   :  { %1639 = vmatprep.subr.mxu0 %v3330_v27  ;;  %1710 = vmatprep.subr.mxu1 %v3336_v30 }
 0x61b   :  { %1640 = vmatpush1.msra.mxu0 %v3342_v31  ;;  %1711 = vmatpush1.msra.mxu1 %v3348_v33  ;;  %v4043_v31 = vld [vmem:[#allocation47_spill] sm:$0xff] }
 0x61c   :  { %1641 = vmatprep.subr.mxu0 %v3354_v34  ;;  %1712 = vmatprep.subr.mxu1 %v3360_v35 }
 0x61d   :  { %1642 = vmatpush1.msra.mxu0 %v3366_v36  ;;  %1713 = vmatpush1.msra.mxu1 %v3372_v37 }
 0x61e   :  { %1643 = vmatprep.subr.mxu0 %v3378_v38  ;;  %1714 = vmatprep.subr.mxu1 %v3384_v39 }
 0x61f   :  { %1644 = vmatpush1.msra.mxu0 %v3390_v40  ;;  %1715 = vmatpush1.msra.mxu1 %v3396_v42 }
 0x620   :  { %1645 = vmatprep.subr.mxu0 %v3402_v43  ;;  %1716 = vmatprep.subr.mxu1 %v3408_v44 }
 0x621   :  { %1646 = vmatpush1.msra.mxu0 %v3414_v45  ;;  %1717 = vmatpush1.msra.mxu1 %v4022_v57 }
 0x622   :  { %1647 = vmatprep.subr.mxu0 %v4023_v7  ;;  %1718 = vmatprep.subr.mxu1 %v4024_v59 }
 0x623   :  { %1648 = vmatpush1.msra.mxu0 %v4025_v63  ;;  %1719 = vmatpush1.msra.mxu1 %v4026_v14 }
 0x624   :  { %1649 = vmatprep.subr.mxu0 %v4027_v1  ;;  %1720 = vmatprep.subr.mxu1 %v4028_v50  ;;  %v1798_v1 = vld [vmem:[#allocation3 + $0x8] sm:$0x1]  ;;  %v1837_v50 = vld [vmem:[#allocation3 + $0x9] sm:$0x1] }
 0x625   :  { %1650 = vmatpush1.msra.mxu0 %v4029_v61  ;;  %1721 = vmatpush1.msra.mxu1 %v4030_v62  ;;  %v1870_v61 = vld [vmem:[#allocation3 + $0xa] sm:$0x1] }
 0x626   :  { %1651 = vmatprep.subr.mxu0 %v4031_v23  ;;  %1722 = vmatprep.subr.mxu1 %v4032_v5  ;;  %v1903_v23 = vld [vmem:[#allocation3 + $0xb] sm:$0x1]  ;;  %v1936_v5 = vld [vmem:[#allocation3 + $0xc] sm:$0x1] }
 0x627   :  { %1652 = vmatpush1.msra.mxu0 %v4033_v58  ;;  %1723 = vmatpush1.msra.mxu1 %v4034_v6  ;;  %v1969_v58 = vld [vmem:[#allocation3 + $0xd] sm:$0x1] }
 0x628   :  { %1653 = vmatprep.subr.mxu0 %v4035_v41  ;;  %1724 = vmatprep.subr.mxu1 %v4036_v8  ;;  %v2002_v41 = vld [vmem:[#allocation3 + $0xe] sm:$0x1]  ;;  %v2035_v8 = vld [vmem:[#allocation3 + $0xf] sm:$0x1] }
 0x629   :  { %1654 = vmatpush1.msra.mxu0 %v4037_v9  ;;  %1687 = vmatprep.mubr.f32.mxu0 %v4038_v10 }
 0x62a   :  { %1725 = vmatpush1.msra.mxu1 %v4039_v11  ;;  %1758 = vmatprep.mubr.f32.mxu1 %v4038_v10  ;;  %v1813_v10 = vrot.slane %v1798_v1, 7  ;;  %v1799_v11 = vld [vmem:[#allocation3 + $0x10] sm:$0x1] }
 0x6ca   :  { %v1512_v12 = vpop.f32.mrf.mxu0  ;;  %v1583_v20 = vpop.f32.mrf.mxu1 }
 0x6cb   :  { %v1588_v15 = vadd.f32 %v1512_v12, %v4040_v13  ;;  %v1590_v33 = vadd.f32 %v1583_v20, %v4043_v31  ;;  %v2017_v20 = vrot.slane %v2002_v41, 7  ;;  %v1871_v31 = vld [vmem:[#allocation3 + $0x12] sm:$0x1] }
 0x6cc   :  { %v1514_v16 = vpop.f32.mrf.mxu0  ;;  %v1585_v22 = vpop.f32.mrf.mxu1 }
 0x6cd   :  { %v2105_v17 = vmul.f32 -1.442695, %v1588_v15  ;;  %v1589_v19 = vadd.f32 %v1514_v16, %v4041_v18  ;;  %v1591_v25 = vadd.f32 %v1585_v22, %v4042_v24  ;;  %v1852_v15 = vrot.slane %v1837_v50, 7  ;;  %v1797_v24 = vld [vmem:[#allocation3] sm:$0x1] }
 0x6ce   :  { %v1885_v16 = vrot.slane %v1870_v61, 7  ;;  %v1951_v18 = vrot.slane %v1936_v5, 7  ;;  %v1840_v5 = vld [vmem:[#allocation3 + $0x21] sm:$0x1] }
 0x6cf   :  { %2215 = vpow2.f32 %v2105_v17  ;;  %v2106_v21 = vmul.f32 -1.442695, %v1589_v19  ;;  %v2107_v27 = vmul.f32 -1.442695, %v1591_v25  ;;  %v1918_v17 = vrot.slane %v1903_v23, 7 }
 0x6d0   :  { %v1984_v19 = vrot.slane %v1969_v58, 7  ;;  %v1836_v25 = vld [vmem:[#allocation3 + $0x1] sm:$0x1]  ;;  %v1801_v23 = vld [vmem:[#allocation3 + $0x20] sm:$0x1] }
 0x6d1   :  { %2217 = vpow2.f32 %v2106_v21  ;;  %v2050_v21 = vrot.slane %v2035_v8, 7 }
 0x6d2   :  { %2219 = vpow2.f32 %v2107_v27  ;;  %v1816_v27 = vrot.slane %v1799_v11, 6  ;;  %v1939_v11 = vld [vmem:[#allocation3 + $0x24] sm:$0x1] }
 0x6dc   :  { %v2216_v30 = vpop.eup %2215 }
 0x6dd   :  { %v1595_v34 = vadd.f32 1.0, %v2216_v30  ;;  %v1838_v30 = vld [vmem:[#allocation3 + $0x11] sm:$0x1] }
 0x6de   :  { %v2218_v35 = vpop.eup %2217 }
 0x6df   :  { %2221 = vrcp.f32 %v1595_v34  ;;  %v1601_v36 = vadd.f32 1.0, %v2218_v35  ;;  %v2220_v37 = vpop.eup %2219  ;;  %v1937_v34 = vld [vmem:[#allocation3 + $0x14] sm:$0x1]  ;;  %v1970_v35 = vld [vmem:[#allocation3 + $0x15] sm:$0x1] }
 0x6e0   :  { %2223 = vtanh.f32 %v1590_v33  ;;  %v1608_v42 = vadd.f32 1.0, %v2220_v37  ;;  %v1904_v33 = vld [vmem:[#allocation3 + $0x13] sm:$0x1]  ;;  %v2036_v37 = vld [vmem:[#allocation3 + $0x17] sm:$0x1] }
 0x6e1   :  { %2225 = vrcp.f32 %v1601_v36  ;;  %v2003_v36 = vld [vmem:[#allocation3 + $0x16] sm:$0x1] }
 0x6e2   :  { %2227 = vrcp.f32 %v1608_v42  ;;  %v1839_v42 = vld [vmem:[#allocation3 + $0x19] sm:$0x1] }
 0x6ec   :  { %v2222_v38 = vpop.eup %2221 }
 0x6ed   :  { %v2224_v39 = vpop.eup %2223 }
 0x6ee   :  { %v2226_v40 = vpop.eup %2225  ;;  %v1612_v43 = vmul.f32 %v2224_v39, %v2222_v38  ;;  %v3678_v38 = vld [vmem:[#allocation3 + $0x18] sm:$0x1]  ;;  %v1815_v39 = vsel %vm1814_vm1, %v1813_v10, %v1797_v24  ;;  %v1906_v10 = vld [vmem:[#allocation3 + $0x23] sm:$0x1] }
 0x6ef   :  { %v1611_v44 = vmul.f32 %v2226_v40, %v3602_v46  ;;  %v2228_v49 = vpop.eup %2227  ;;  %v1853_v40 = vsel %vm1814_vm1, %v1852_v15, %v1836_v25  ;;  %v1818_v50 = vsel %vm1817_vm2, %v1816_v27, %v1815_v39  ;;  %v1924_v25 = vrot.slane %v1906_v10, 4 }
 0x6f0   :  { %v1957_v27 = vrot.slane %v1939_v11, 4 }
 0x6f1   :  { %v1613_v45 = vadd.f32 %v1612_v43, %v1611_v44  ;;  %v3682_v43 = vld [vmem:[#allocation3 + $0x1a] sm:$0x1]  ;;  %v3684_v44 = vld [vmem:[#allocation3 + $0x1b] sm:$0x1] }
 0x6f3   :  { %2229 = vtanh.f32 %v1613_v45 }
 0x700   :  { %v2230_v28 = vpop.eup %2229 }
 0x701   :  { %v1615_v4 = vmul.f32 %v2230_v28, %v2228_v49  ;;  %v1902_v49 = vld [vmem:[#allocation3 + $0x3] sm:$0x1]  ;;  %v1935_v28 = vld [vmem:[#allocation3 + $0x4] sm:$0x1] }
 0x703   :  { %1617 = vst [vmem:[#allocation3 + $0x30] sm:$0xff] %v1615_v4  ;;  %1688 = vmatmul.mubr.f32.vlgmr.msra.gmra.mxu0 %v1615_v4  ;;  %1759 = vmatmul.mubr.f32.vlgmr.msra.gmra.mxu1 %v1615_v4  ;;  %v1968_v4 = vld [vmem:[#allocation3 + $0x5] sm:$0x1] }
 0x7c3   :  { %v1689_v47 = vpop.f32.mrf.mxu0  ;;  %v1760_v2 = vpop.f32.mrf.mxu1 }
 0x7c4   :  { %v1765_v3 = vadd.f32 %v1689_v47, %v4044_v48  ;;  %v1767_v0 = vadd.f32 %v1760_v2, %v4047_v51  ;;  %v1854_v47 = vrot.slane %v1838_v30, 6  ;;  %v1887_v48 = vrot.slane %v1871_v31, 6  ;;  %v2038_v30 = vld [vmem:[#allocation3 + $0x27] sm:$0x1] }
 0x7c5   :  { %v1691_v55 = vpop.f32.mrf.mxu0  ;;  %v1762_v53 = vpop.f32.mrf.mxu1  ;;  %v2052_v2 = vrot.slane %v2036_v37, 6  ;;  %v1919_v51 = vsel %vm1814_vm1, %v1918_v17, %v1902_v49  ;;  %v1972_v17 = vld [vmem:[#allocation3 + $0x25] sm:$0x1]  ;;  %v1802_v37 = vld [vmem:[#allocation3 + $0x28] sm:$0x1] }
 0x7c6   :  { %v2108_v56 = vmul.f32 -1.442695, %v1765_v3  ;;  %v1766_v32 = vadd.f32 %v1691_v55, %v4045_v60  ;;  %v1768_v26 = vadd.f32 %v1762_v53, %v4046_v52  ;;  %v1920_v3 = vrot.slane %v1904_v33, 6  ;;  %v1907_v49 = vld [vmem:[#allocation3 + $0x2b] sm:$0x1] }
 0x7c7   :  { %v1953_v55 = vrot.slane %v1937_v34, 6  ;;  %v1986_v60 = vrot.slane %v1970_v35, 6  ;;  %v1819_v53 = vrot.slane %v3678_v38, 5  ;;  %v1856_v52 = vrot.slane %v1839_v42, 5  ;;  %v1841_v38 = vld [vmem:[#allocation3 + $0x29] sm:$0x1] }
 0x7c8   :  { %2231 = vpow2.f32 %v2108_v56  ;;  %v2109_v54 = vmul.f32 -1.442695, %v1766_v32  ;;  %v2110_v46 = vmul.f32 -1.442695, %v1768_v26  ;;  %v2001_v56 = vld [vmem:[#allocation3 + $0x6] sm:$0x1]  ;;  %v1855_v61 = vsel %vm1817_vm2, %v1854_v47, %v1853_v40 }
 0x7c9   :  { %v2019_v32 = vrot.slane %v2003_v36, 6  ;;  %v1889_v26 = vrot.slane %v3682_v43, 5  ;;  %v1821_v33 = vsel %vm1820_vm3, %v1819_v53, %v1818_v50  ;;  %v1857_v34 = vsel %vm1820_vm3, %v1856_v52, %v1855_v61  ;;  %v1875_v61 = vld [vmem:[#allocation3 + $0x32] sm:$0x1] }
 0x7ca   :  { %2233 = vpow2.f32 %v2109_v54  ;;  %v2034_v54 = vld [vmem:[#allocation3 + $0x7] sm:$0x1]  ;;  %v1990_v35 = vrot.slane %v1972_v17, 4 }
 0x7cb   :  { %2235 = vpow2.f32 %v2110_v46  ;;  %v1922_v46 = vrot.slane %v3684_v44, 5  ;;  %v2051_v1 = vsel %vm1814_vm1, %v2050_v21, %v2034_v54  ;;  %v1822_v21 = vrot.slane %v1801_v23, 4  ;;  %v1941_v23 = vld [vmem:[#allocation3 + $0x34] sm:$0x1] }
 0x7cc   :  { %v1860_v54 = vrot.slane %v1841_v38, 3  ;;  %v1961_v17 = vrot.slane %v1941_v23, 2 }
 0x7d5   :  { %v2232_v29 = vpop.eup %2231 }
 0x7d6   :  { %v1772_v57 = vadd.f32 1.0, %v2232_v29 }
 0x7d7   :  { %v2234_v7 = vpop.eup %2233 }
 0x7d8   :  { %2237 = vrcp.f32 %v1772_v57  ;;  %v1778_v59 = vadd.f32 1.0, %v2234_v7  ;;  %v2236_v63 = vpop.eup %2235  ;;  %v1985_v57 = vsel %vm1814_vm1, %v1984_v19, %v1968_v4  ;;  %v1938_v7 = vld [vmem:[#allocation3 + $0x1c] sm:$0x1] }
 0x7d9   :  { %2239 = vtanh.f32 %v1767_v0  ;;  %v1785_v9 = vadd.f32 1.0, %v2236_v63  ;;  %v1952_v0 = vsel %vm1814_vm1, %v1951_v18, %v1935_v28  ;;  %v2004_v63 = vld [vmem:[#allocation3 + $0x1e] sm:$0x1]  ;;  %v1987_v8 = vsel %vm1817_vm2, %v1986_v60, %v1985_v57  ;;  %v2005_v18 = vld [vmem:[#allocation3 + $0x26] sm:$0x1] }
 0x7da   :  { %2241 = vrcp.f32 %v1778_v59  ;;  %v1971_v59 = vld [vmem:[#allocation3 + $0x1d] sm:$0x1]  ;;  %v1954_v41 = vsel %vm1817_vm2, %v1953_v55, %v1952_v0  ;;  %v1955_v15 = vrot.slane %v1938_v7, 5  ;;  %v2021_v19 = vrot.slane %v2004_v63, 5  ;;  %v1940_v28 = vld [vmem:[#allocation3 + $0x2c] sm:$0x1] }
 0x7db   :  { %2243 = vrcp.f32 %v1785_v9  ;;  %v1873_v9 = vld [vmem:[#allocation3 + $0x22] sm:$0x1]  ;;  %v2023_v36 = vrot.slane %v2005_v18, 4  ;;  %v2006_v55 = vld [vmem:[#allocation3 + $0x2e] sm:$0x1]  ;;  %v1959_v0 = vrot.slane %v1940_v28, 3 }
 0x7dc   :  { %v1891_v24 = vrot.slane %v1873_v9, 4  ;;  %v1956_v43 = vsel %vm1820_vm3, %v1955_v15, %v1954_v41  ;;  %v2025_v7 = vrot.slane %v2006_v55, 3  ;;  %v2007_v9 = vld [vmem:[#allocation3 + $0x36] sm:$0x1]  ;;  %v1895_v15 = vrot.slane %v1875_v61, 2 }
 0x7dd   :  { %v2040_v18 = vld [vmem:[#allocation3 + $0x37] sm:$0x1] }
 0x7e5   :  { %v2238_v14 = vpop.eup %2237 }
 0x7e6   :  { %v2240_v62 = vpop.eup %2239 }
 0x7e7   :  { %v2242_v6 = vpop.eup %2241  ;;  %v1789_v12 = vmul.f32 %v2240_v62, %v2238_v14  ;;  %v2018_v14 = vsel %vm1814_vm1, %v2017_v20, %v2001_v56  ;;  %v2037_v62 = vld [vmem:[#allocation3 + $0x1f] sm:$0x1]  ;;  %v2039_v56 = vld [vmem:[#allocation3 + $0x2f] sm:$0x1] }
 0x7e8   :  { %v1788_v13 = vmul.f32 %v2242_v6, %v1613_v45  ;;  %v1869_v45 = vld [vmem:[#allocation3 + $0x2] sm:$0x1]  ;;  %v1921_v6 = vsel %vm1817_vm2, %v1920_v3, %v1919_v51  ;;  %v2054_v20 = vrot.slane %v2037_v62, 5  ;;  %v2244_v31 = vpop.eup %2243  ;;  %v1973_v3 = vld [vmem:[#allocation3 + $0x2d] sm:$0x1] }
 0x7e9   :  { %v1886_v29 = vsel %vm1814_vm1, %v1885_v16, %v1869_v45  ;;  %v1988_v16 = vrot.slane %v1971_v59, 5  ;;  %v1923_v42 = vsel %vm1820_vm3, %v1922_v46, %v1921_v6  ;;  %v1874_v45 = vld [vmem:[#allocation3 + $0x2a] sm:$0x1]  ;;  %v1926_v46 = vrot.slane %v1907_v49, 3  ;;  %v1842_v51 = vld [vmem:[#allocation3 + $0x31] sm:$0x1] }
 0x7ea   :  { %v1790_v22 = vadd.f32 %v1789_v12, %v1788_v13  ;;  %v1888_v58 = vsel %vm1817_vm2, %v1887_v48, %v1886_v29  ;;  %v2020_v12 = vsel %vm1817_vm2, %v2019_v32, %v2018_v14  ;;  %v2053_v13 = vsel %vm1817_vm2, %v2052_v2, %v2051_v1  ;;  %v1803_v29 = vld [vmem:[#allocation3 + $0x30] sm:$0x1]  ;;  %v1908_v62 = vld [vmem:[#allocation3 + $0x33] sm:$0x1] }
 0x7eb   :  { %v1890_v40 = vsel %vm1820_vm3, %v1889_v26, %v1888_v58  ;;  %v1989_v44 = vsel %vm1820_vm3, %v1988_v16, %v1987_v8  ;;  %v2022_v4 = vsel %vm1820_vm3, %v2021_v19, %v2020_v12  ;;  %v2055_v47 = vsel %vm1820_vm3, %v2054_v20, %v2053_v13  ;;  %v1974_v8 = vld [vmem:[#allocation3 + $0x35] sm:$0x1] }
 0x7ec   :  { %2245 = vtanh.f32 %v1790_v22  ;;  %v1858_v22 = vrot.slane %v1840_v5, 4  ;;  %v1824_v48 = vsel %vm1823_vm4, %v1822_v21, %v1821_v33  ;;  %v2056_v32 = vrot.slane %v2038_v30, 4 }
 0x7ed   :  { %v1825_v2 = vrot.slane %v1802_v37, 3  ;;  %v1892_v52 = vsel %vm1823_vm4, %v1891_v24, %v1890_v40  ;;  %v1893_v26 = vrot.slane %v1874_v45, 3  ;;  %v1992_v57 = vrot.slane %v1973_v3, 3 }
 0x7ee   :  { %v1859_v53 = vsel %vm1823_vm4, %v1858_v22, %v1857_v34  ;;  %v2058_v59 = vrot.slane %v2039_v56, 3  ;;  %v1925_v63 = vsel %vm1823_vm4, %v1924_v25, %v1923_v42  ;;  %v1958_v14 = vsel %vm1823_vm4, %v1957_v27, %v1956_v43 }
 0x7ef   :  { %v1991_v1 = vsel %vm1823_vm4, %v1990_v35, %v1989_v44  ;;  %v2024_v50 = vsel %vm1823_vm4, %v2023_v36, %v2022_v4  ;;  %v2057_v5 = vsel %vm1823_vm4, %v2056_v32, %v2055_v47  ;;  %v1827_v58 = vsel %vm1826_vm5, %v1825_v2, %v1824_v48 }
 0x7f0   :  { %v1828_v6 = vrot.slane %v1803_v29, 2  ;;  %v1862_v41 = vrot.slane %v1842_v51, 2  ;;  %v1861_v10 = vsel %vm1826_vm5, %v1860_v54, %v1859_v53  ;;  %v1894_v11 = vsel %vm1826_vm5, %v1893_v26, %v1892_v52 }
 0x7f1   :  { %v1927_v12 = vsel %vm1826_vm5, %v1926_v46, %v1925_v63  ;;  %v1960_v13 = vsel %vm1826_vm5, %v1959_v0, %v1958_v14  ;;  %v1928_v16 = vrot.slane %v1908_v62, 2  ;;  %v1993_v19 = vsel %vm1826_vm5, %v1992_v57, %v1991_v1 }
 0x7f2   :  { %v1994_v20 = vrot.slane %v1974_v8, 2  ;;  %v2027_v21 = vrot.slane %v2007_v9, 2  ;;  %v2026_v22 = vsel %vm1826_vm5, %v2025_v7, %v2024_v50  ;;  %v2059_v24 = vsel %vm1826_vm5, %v2058_v59, %v2057_v5 }
 0x7f3   :  { %v1830_v25 = vsel %vm1829_vm6, %v1828_v6, %v1827_v58  ;;  %v1863_v27 = vsel %vm1829_vm6, %v1862_v41, %v1861_v10  ;;  %v2060_v34 = vrot.slane %v2040_v18, 2  ;;  %v1929_v40 = vsel %vm1829_vm6, %v1928_v16, %v1927_v12 }
 0x7f4   :  { %v1962_v42 = vsel %vm1829_vm6, %v1961_v17, %v1960_v13  ;;  %v1995_v2 = vsel %vm1829_vm6, %v1994_v20, %v1993_v19  ;;  %v2028_v54 = vsel %vm1829_vm6, %v2027_v21, %v2026_v22 }
 0x7f5   :  { %v2061_v53 = vsel %vm1829_vm6, %v2060_v34, %v2059_v24 }
 0x7f9   :  { %v2246_v39 = vpop.eup %2245 }
 0x7fa   :  { %v1792_v60 = vmul.f32 %v2246_v39, %v2244_v31  ;;  %v1896_v39 = vsel %vm1829_vm6, %v1895_v15, %v1894_v11 }
 0x7fc   :  { %1794 = vst [vmem:[#allocation3 + $0x38] sm:$0xff] %v1792_v60 }
 0x803   :  { %v1804_v30 = vld [vmem:[#allocation3 + $0x38] sm:$0x1]  ;;  %v1843_v31 = vld [vmem:[#allocation3 + $0x39] sm:$0x1]  ;;  %v1876_v33 = vld [vmem:[#allocation3 + $0x3a] sm:$0x1] }
 0x804   :  { %v1831_v35 = vrot.slane %v1804_v30, 1  ;;  %v1864_v36 = vrot.slane %v1843_v31, 1  ;;  %v1897_v37 = vrot.slane %v1876_v33, 1  ;;  %v1909_v38 = vld [vmem:[#allocation3 + $0x3b] sm:$0x1] }
 0x805   :  { %v1930_v43 = vrot.slane %v1909_v38, 1  ;;  %v1942_v44 = vld [vmem:[#allocation3 + $0x3c] sm:$0x1]  ;;  %v1975_v45 = vld [vmem:[#allocation3 + $0x3d] sm:$0x1] }
 0x806   :  { %v1833_v49 = vsel %vm1832_vm7, %v1831_v35, %v1830_v25  ;;  %v1865_v28 = vsel %vm1832_vm7, %v1864_v36, %v1863_v27  ;;  %v1898_v4 = vsel %vm1832_vm7, %v1897_v37, %v1896_v39  ;;  %v1963_v47 = vrot.slane %v1942_v44, 1  ;;  %v2008_v48 = vld [vmem:[#allocation3 + $0x3e] sm:$0x1]  ;;  %v2041_v3 = vld [vmem:[#allocation3 + $0x3f] sm:$0x1] }
 0x807   :  { %1835 = vst [vmem:[%s3770_s3] sm:$0xff] %v1833_v49  ;;  %2111 = vst [vmem:[%s3770_s3 + $0x8] sm:$0xff] %v1865_v28  ;;  %v1931_v55 = vsel %vm1832_vm7, %v1930_v43, %v1929_v40  ;;  %v1996_v56 = vrot.slane %v1975_v45, 1  ;;  %v2029_v60 = vrot.slane %v2008_v48, 1  ;;  %v2062_v32 = vrot.slane %v2041_v3, 1 }
 0x808   :  { %2112 = vst [vmem:[%s3770_s3 + $0x10] sm:$0xff] %v1898_v4  ;;  %2113 = vst [vmem:[%s3770_s3 + $0x18] sm:$0xff] %v1931_v55  ;;  %v1964_v52 = vsel %vm1832_vm7, %v1963_v47, %v1962_v42 }
 0x809   :  { %2114 = vst [vmem:[%s3770_s3 + $0x20] sm:$0xff] %v1964_v52  ;;  %v1997_v26 = vsel %vm1832_vm7, %v1996_v56, %v1995_v2  ;;  %v2030_v46 = vsel %vm1832_vm7, %v2029_v60, %v2028_v54  ;;  %v2063_v29 = vsel %vm1832_vm7, %v2062_v32, %v2061_v53 }
 0x80a   :  { %2115 = vst [vmem:[%s3770_s3 + $0x28] sm:$0xff] %v1997_v26  ;;  %2116 = vst [vmem:[%s3770_s3 + $0x30] sm:$0xff] %v2030_v46 }
 0x80b   :  { %2117 = vst [vmem:[%s3770_s3 + $0x38] sm:$0xff] %v2063_v29 }

</bundles_post_ra>
